<compile_context>
chip_gen: v6e
topology: v6e:2x2x1
jax: 0.10.0
libtpu: 0.0.40
codegen_flags: <defaults>
</compile_context>

<pallas_src>
import functools
import math

import jax
import jax.numpy as jnp
from jax.experimental import pallas as pl
from jax.experimental.pallas import tpu as pltpu


# ----------------------------- helpers ------------------------------

def _round_up(x, m):
    return ((x + m - 1) // m) * m


def _pick_tile(dim, pref):
    """Full-extent block for small dims (always layout-legal), else `pref` + zero pad."""
    if dim <= pref:
        return dim, dim
    return pref, _round_up(dim, pref)


def _gelu_tanh(y):
    # tanh approximation: the transcendental goes to the EUP slot instead of ~10 VALU ops.
    # (Differs from torch's exact erf GELU by ~3e-4 max abs.)
    c = 0.7978845608028654  # sqrt(2/pi)
    return 0.5 * y * (1.0 + jnp.tanh(c * (y + 0.044715 * y * y * y)))


def _compiler_params(semantics, est_bytes):
    # Raise the scoped-VMEM limit when the per-step footprint needs it (v5e default is
    # only 16 MiB) but stay well under v7x's 64 MiB physical VMEM.
    limit = int(min(max(2 * est_bytes, 32 * 1024 * 1024), 56 * 1024 * 1024))
    return pltpu.CompilerParams(dimension_semantics=semantics,
                                vmem_limit_bytes=limit)


# ----------------------------- Pallas kernels ------------------------------

def _fused_matmul_kernel(*refs, nk, fuse_ln, activation, has_residual, ln_eps):
    """(optional LN) -> x @ w + b (-> optional GELU) (-> optional + residual).

    refs = x, w, b, [gamma, beta], [residual], out, [xln | acc] scratch
    Grid: (M/tm, N/tn, K/tk).  With fuse_ln the K axis is a single block (nk == 1) so the
    LayerNorm row statistics are exact, and the normalized bf16 x block is cached in VMEM
    at j == 0 and reused for every N tile of the same row block.
    """
    idx = 0
    x_ref = refs[idx]; idx += 1
    w_ref = refs[idx]; idx += 1
    b_ref = refs[idx]; idx += 1
    if fuse_ln:
        g_ref = refs[idx]; idx += 1
        be_ref = refs[idx]; idx += 1
    if has_residual:
        r_ref = refs[idx]; idx += 1
    o_ref = refs[idx]; idx += 1
    if fuse_ln:
        xln_ref = refs[idx]; idx += 1          # (tm, K) bf16, cached LN(x)
    elif nk > 1:
        acc_ref = refs[idx]; idx += 1          # (tm, tn) f32 K-loop accumulator

    k = pl.program_id(2)

    if fuse_ln:
        @pl.when(pl.program_id(1) == 0)        # compute LN once per M tile, reuse over N
        def _():
            x = x_ref[...].astype(jnp.float32)
            mean = jnp.mean(x, axis=-1, keepdims=True)
            var = jnp.mean(jnp.square(x - mean), axis=-1, keepdims=True)  # biased, like torch
            xn = (x - mean) * jax.lax.rsqrt(var + ln_eps)
            xln_ref[...] = (xn * g_ref[...] + be_ref[...]).astype(jnp.bfloat16)
        xb = xln_ref[...]
    else:
        xb = x_ref[...].astype(jnp.bfloat16)   # activations already bf16: no-op cast
    wb = w_ref[...].astype(jnp.bfloat16)

    def _finish(y):
        y = y + b_ref[...].astype(jnp.float32)
        if activation == "gelu":
            y = _gelu_tanh(y)
        if has_residual:
            y = y + r_ref[...].astype(jnp.float32)
        return y.astype(o_ref.dtype)

    if nk == 1:
        # Single K block: skip the f32 accumulator round trip entirely.
        o_ref[...] = _finish(jnp.dot(xb, wb, preferred_element_type=jnp.float32))
    else:
        @pl.when(k == 0)
        def _():
            acc_ref[...] = jnp.zeros(acc_ref.shape, jnp.float32)

        acc_ref[...] += jnp.dot(xb, wb, preferred_element_type=jnp.float32)

        @pl.when(k == nk - 1)
        def _():
            o_ref[...] = _finish(acc_ref[...])


def _flash_attn_kernel(q_ref, k_ref, v_ref, o_ref, m_sc, l_sc, acc_sc, *,
                       scale, num_heads, head_dim, tq, tkv):
    # tq == tkv, so the last KV tile with any unmasked (causal) position is simply qi.
    qi = pl.program_id(1)
    ki = pl.program_id(2)

    @pl.when(ki == 0)
    def _():
        m_sc[...] = jnp.full(m_sc.shape, -1e30, jnp.float32)
        l_sc[...] = jnp.zeros(l_sc.shape, jnp.float32)
        acc_sc[...] = jnp.zeros(acc_sc.shape, jnp.float32)

    @pl.when(ki <= qi)          # skip fully-masked KV tiles (~2x attention FLOPs saved)
    def _():
        q = q_ref[0].astype(jnp.bfloat16)      # (tq, E), lane-dense load
        kk = k_ref[0].astype(jnp.bfloat16)     # (tkv, E)
        v = v_ref[0].astype(jnp.bfloat16)      # (tkv, E)
        row = qi * tq + jax.lax.broadcasted_iota(jnp.int32, (tq, tkv), 0)
        col = ki * tkv + jax.lax.broadcasted_iota(jnp.int32, (tq, tkv), 1)
        causal = row >= col                    # in-kernel causal mask (no SxS mask in HBM)
        for h in range(num_heads):             # static unroll over heads (in-register slices)
            sl = slice(h * head_dim, (h + 1) * head_dim)
            qh, kh, vh = q[:, sl], kk[:, sl], v[:, sl]
            # q @ k^T without an in-kernel transpose: contract the last dims of both.
            s = jax.lax.dot_general(qh, kh, (((1,), (1,)), ((), ())),
                                    preferred_element_type=jnp.float32) * scale
            s = jnp.where(causal, s, -1e30)
            m_prev = m_sc[h]
            m_new = jnp.maximum(m_prev, jnp.max(s, axis=-1, keepdims=True))
            alpha = jnp.exp(m_prev - m_new)
            p = jnp.exp(s - m_new)
            l_sc[h] = alpha * l_sc[h] + jnp.sum(p, axis=-1, keepdims=True)
            acc_sc[h] = alpha * acc_sc[h] + jnp.dot(
                p.astype(jnp.bfloat16), vh, preferred_element_type=jnp.float32)
            m_sc[h] = m_new

    @pl.when(ki == qi)          # last unmasked KV tile for this Q tile: finalize
    def _():
        outs = []
        for h in range(num_heads):
            inv_l = pl.reciprocal(l_sc[h], approx=True)
            outs.append(acc_sc[h] * inv_l)
        # one full-width (lane-dense) store instead of per-head masked partial stores
        o_ref[0] = jnp.concatenate(outs, axis=-1).astype(o_ref.dtype)


# ----------------------------- kernel wrappers ------------------------------

def fused_linear(x, w, b, *, gamma=None, beta=None, residual=None, activation=None,
                 out_dtype=jnp.bfloat16, tm=256, tn=512, tk=512, ln_eps=1e-5):
    """y = [LN(x)] @ w + b, optionally GELU'd and/or with a residual added."""
    M, K = x.shape
    Kw, N = w.shape
    assert Kw == K
    fuse_ln = gamma is not None
    has_res = residual is not None

    if fuse_ln and K >= 4096:
        tm = min(tm, 128)        # keep full-K (tm, K) blocks inside v5e/v7x VMEM budgets
    tm, Mp = _pick_tile(M, tm)
    tn, Np = _pick_tile(N, tn)
    if fuse_ln:
        tk, Kp = K, K            # LN needs the full feature row; single K block
    else:
        tk, Kp = _pick_tile(K, tk)
    nk = Kp // tk

    xp = x if (Mp == M and Kp == K) else jnp.pad(x, ((0, Mp - M), (0, Kp - K)))
    wp = w if (Kp == K and Np == N) else jnp.pad(w, ((0, Kp - K), (0, Np - N)))
    bp = (b if Np == N else jnp.pad(b, (0, Np - N))).reshape(1, Np).astype(jnp.float32)

    args = [xp, wp, bp]
    in_specs = [
        pl.BlockSpec((tm, tk), lambda i, j, k: (i, k)),
        pl.BlockSpec((tk, tn), lambda i, j, k: (k, j)),
        pl.BlockSpec((1, tn), lambda i, j, k: (0, j)),
    ]
    if fuse_ln:
        args += [gamma.reshape(1, K).astype(jnp.float32),
                 beta.reshape(1, K).astype(jnp.float32)]
        in_specs += [pl.BlockSpec((1, K), lambda i, j, k: (0, 0)),
                     pl.BlockSpec((1, K), lambda i, j, k: (0, 0))]
    if has_res:
        rp = residual if (Mp == M and Np == N) else jnp.pad(
            residual, ((0, Mp - M), (0, Np - N)))
        args.append(rp)
        in_specs.append(pl.BlockSpec((tm, tn), lambda i, j, k: (i, j)))

    scratch_shapes = []
    if fuse_ln:
        scratch_shapes.append(pltpu.VMEM((tm, Kp), jnp.bfloat16))   # cached LN(x)
    elif nk > 1:
        scratch_shapes.append(pltpu.VMEM((tm, tn), jnp.float32))    # K-loop accumulator

    # LN caching relies on the N axis running sequentially from j == 0 on one core, so it
    # must not be megacore-sharded; the M axis stays "parallel" for 2-TC chips (v7x).
    semantics = (("parallel", "arbitrary", "arbitrary") if fuse_ln
                 else ("parallel", "parallel", "arbitrary"))

    est = 2 * (tm * tk * xp.dtype.itemsize + tk * tn * wp.dtype.itemsize
               + tm * tn * jnp.dtype(out_dtype).itemsize)
    est += tm * tn * 4 + tm * Kp * 2
    if has_res:
        est += 2 * tm * tn * rp.dtype.itemsize

    kern = functools.partial(_fused_matmul_kernel, nk=nk, fuse_ln=fuse_ln,
                             activation=activation, has_residual=has_res, ln_eps=ln_eps)

    out = pl.pallas_call(
        kern,
        out_shape=jax.ShapeDtypeStruct((Mp, Np), out_dtype),
        grid=(Mp // tm, Np // tn, nk),
        in_specs=in_specs,
        out_specs=pl.BlockSpec((tm, tn), lambda i, j, k: (i, j)),
        scratch_shapes=scratch_shapes,
        compiler_params=_compiler_params(semantics, est),
    )(*args)
    if Mp != M or Np != N:
        out = out[:M, :N]
    return out


def flash_attention(q, k, v, *, num_heads, scale, tile=256):
    """Causal MHA on (B, S, E) activations; heads are handled inside the kernel."""
    B, S, E = q.shape
    head_dim = E // num_heads
    t, Sp = _pick_tile(S, tile)
    if Sp != S:
        pad = ((0, 0), (0, Sp - S), (0, 0))
        q, k, v = jnp.pad(q, pad), jnp.pad(k, pad), jnp.pad(v, pad)
    n = Sp // t          # same tile for Q and KV, so the causal clamp is just min(ki, qi)

    def q_map(b, qi, ki):
        return (b, qi, 0)

    def kv_map(b, qi, ki):
        # Fully-masked KV tiles map back to the block that is already resident, so Pallas
        # skips the DMA; pl.when inside the kernel skips the compute.
        return (b, jnp.minimum(ki, qi), 0)

    kern = functools.partial(_flash_attn_kernel, scale=scale, num_heads=num_heads,
                             head_dim=head_dim, tq=t, tkv=t)
    est = 2 * 4 * t * E * q.dtype.itemsize + num_heads * t * (head_dim + 2) * 4

    out = pl.pallas_call(
        kern,
        out_shape=jax.ShapeDtypeStruct((B, Sp, E), q.dtype),
        grid=(B, n, n),
        in_specs=[pl.BlockSpec((1, t, E), q_map),
                  pl.BlockSpec((1, t, E), kv_map),
                  pl.BlockSpec((1, t, E), kv_map)],
        out_specs=pl.BlockSpec((1, t, E), q_map),
        scratch_shapes=[pltpu.VMEM((num_heads, t, 1), jnp.float32),
                        pltpu.VMEM((num_heads, t, 1), jnp.float32),
                        pltpu.VMEM((num_heads, t, head_dim), jnp.float32)],
        compiler_params=_compiler_params(("parallel", "parallel", "arbitrary"), est),
    )(q, k, v)
    if Sp != S:
        out = out[:, :S, :]
    return out


# ----------------------------- model (glue in JAX) ------------------------------

def init_gpt_params(key, vocab_size, embed_dim, num_heads, num_layers, max_len):
    del num_heads
    std = 0.02
    keys = jax.random.split(key, 3 + 4 * num_layers)

    def w(k, shape):  # matmul weights live in bf16 (MXU operand dtype), stored pre-transposed
        return (std * jax.random.normal(k, shape, jnp.float32)).astype(jnp.bfloat16)

    params = {
        "token_emb": std * jax.random.normal(keys[0], (vocab_size, embed_dim), jnp.float32),
        "pos_emb":   std * jax.random.normal(keys[1], (max_len, embed_dim), jnp.float32),
        "ln_f_g": jnp.ones((embed_dim,), jnp.float32),
        "ln_f_b": jnp.zeros((embed_dim,), jnp.float32),
        "head_w": w(keys[2], (embed_dim, vocab_size)),
        "head_b": jnp.zeros((vocab_size,), jnp.float32),
        "layers": [],
    }
    for l in range(num_layers):
        k0, k1, k2, k3 = keys[3 + 4 * l: 3 + 4 * l + 4]
        params["layers"].append({
            "ln1_g": jnp.ones((embed_dim,), jnp.float32),
            "ln1_b": jnp.zeros((embed_dim,), jnp.float32),
            "ln2_g": jnp.ones((embed_dim,), jnp.float32),
            "ln2_b": jnp.zeros((embed_dim,), jnp.float32),
            "in_proj_w":  w(k0, (embed_dim, 3 * embed_dim)),
            "in_proj_b":  jnp.zeros((3 * embed_dim,), jnp.float32),
            "out_proj_w": w(k1, (embed_dim, embed_dim)),
            "out_proj_b": jnp.zeros((embed_dim,), jnp.float32),
            "fc1_w": w(k2, (embed_dim, 4 * embed_dim)),
            "fc1_b": jnp.zeros((4 * embed_dim,), jnp.float32),
            "fc2_w": w(k3, (4 * embed_dim, embed_dim)),
            "fc2_b": jnp.zeros((embed_dim,), jnp.float32),
        })
    return params


def gpt_block(x, p, num_heads):
    B, S, E = x.shape
    xf = x.reshape(B * S, E)

    # ---- self-attention sub-block: LN1 fused into the QKV projection ----
    qkv = fused_linear(xf, p["in_proj_w"], p["in_proj_b"],
                       gamma=p["ln1_g"], beta=p["ln1_b"],
                       out_dtype=jnp.bfloat16)                         # (B*S, 3E) bf16
    q, k, v = jnp.split(qkv, 3, axis=-1)
    q, k, v = (t.reshape(B, S, E) for t in (q, k, v))
    # Heads are selected inside the attention kernel (static column slices), so there are
    # no XLA head split/merge transposes and attention loads/stores stay lane-dense.
    o = flash_attention(q, k, v, num_heads=num_heads,
                        scale=1.0 / math.sqrt(E // num_heads))         # (B, S, E) bf16
    x1 = fused_linear(o.reshape(B * S, E), p["out_proj_w"], p["out_proj_b"],
                      residual=xf, out_dtype=jnp.bfloat16)             # x + attn_out

    # ---- MLP sub-block: LN2 fused into fc1 (+GELU); fc2 fused with the residual ----
    h = fused_linear(x1, p["fc1_w"], p["fc1_b"],
                     gamma=p["ln2_g"], beta=p["ln2_b"], activation="gelu",
                     out_dtype=jnp.bfloat16)
    x2 = fused_linear(h, p["fc2_w"], p["fc2_b"], residual=x1,
                      out_dtype=jnp.bfloat16)                          # x + mlp_out
    return x2.reshape(B, S, E)


def gpt_encoder_forward(params, input_ids, num_heads):
    B, S = input_ids.shape
    E = params["token_emb"].shape[1]
    vocab = params["head_w"].shape[1]

    # TODO(synk): the token/position embedding gather stays in XLA — a data-dependent row
    # gather has no clean rectangular BlockSpec at these sizes.
    tok = params["token_emb"][input_ids]
    pos = params["pos_emb"][:S]
    x = (tok + pos[None, :, :]).astype(jnp.bfloat16)   # activations are bf16 end-to-end
    # self.dropout(x): identity (eval semantics)

    for p in params["layers"]:
        x = gpt_block(x, p, num_heads)

    # Final LayerNorm fused into the LM head matmul.  Logits kept in f32 for fidelity;
    # switch out_dtype to bf16 if the consumer tolerates it (halves the largest DMA).
    xf = x.reshape(B * S, E)
    logits = fused_linear(xf, params["head_w"], params["head_b"],
                          gamma=params["ln_f_g"], beta=params["ln_f_b"],
                          out_dtype=jnp.float32)
    return logits.reshape(B, S, vocab)


# ----------------------------- demo ------------------------------

if __name__ == "__main__":
    vocab_size = 32
    embed_dim = 32
    num_heads = 4
    num_layers = 2
    max_len = 16
    batch, seq = 2, 8

    key = jax.random.PRNGKey(0)
    pkey, ikey = jax.random.split(key)
    params = init_gpt_params(pkey, vocab_size, embed_dim, num_heads, num_layers, max_len)
    input_ids = jax.random.randint(ikey, (batch, seq), 0, vocab_size, dtype=jnp.int32)

    fwd = jax.jit(functools.partial(gpt_encoder_forward, num_heads=num_heads))
    logits = jax.block_until_ready(fwd(params, input_ids))

    assert logits.shape == (batch, seq, vocab_size), logits.shape
    assert bool(jnp.all(jnp.isfinite(logits)))
    print("KERNEL_OK")
</pallas_src>

<mosaic_0001>
module attributes {stable_mosaic.version = 11 : i64} {
  func.func @_fused_matmul_kernel(%arg0: i32, %arg1: i32, %arg2: i32, %arg3: memref<16x32xbf16, #tpu.memory_space<vmem>>, %arg4: memref<32x128xbf16, #tpu.memory_space<vmem>>, %arg5: memref<1x128xf32, #tpu.memory_space<vmem>>, %arg6: memref<1x32xf32, #tpu.memory_space<vmem>>, %arg7: memref<1x32xf32, #tpu.memory_space<vmem>>, %arg8: memref<16x128xbf16, #tpu.memory_space<vmem>>, %arg9: memref<16x32xbf16, #tpu.memory_space<vmem>>) attributes {dimension_semantics = [#tpu.dimension_semantics<parallel>, #tpu.dimension_semantics<arbitrary>, #tpu.dimension_semantics<arbitrary>], iteration_bounds = array<i64: 1, 1, 1>, scalar_prefetch = 0 : i64, scratch_operands = 1 : i64, tpu.core_type = #tpu.core_type<tc>, window_params = [{transform_indices = @transform_0, window_bounds = array<i64: 16, 32>}, {transform_indices = @transform_1, window_bounds = array<i64: 32, 128>}, {transform_indices = @transform_2, window_bounds = array<i64: 1, 128>}, {pipeline_mode = #tpu.pipeline_mode<synchronous>, transform_indices = @transform_3, window_bounds = array<i64: 1, 32>}, {pipeline_mode = #tpu.pipeline_mode<synchronous>, transform_indices = @transform_4, window_bounds = array<i64: 1, 32>}, {transform_indices = @transform_5, window_bounds = array<i64: 16, 128>}]} {
    %c0_i32 = arith.constant 0 : i32
    %0 = arith.cmpi eq, %arg1, %c0_i32 : i32
    %1 = arith.extui %0 : i1 to i32
    %c0_i32_0 = arith.constant 0 : i32
    %2 = arith.cmpi ne, %1, %c0_i32_0 : i32
    scf.if %2 {
      %c0_12 = arith.constant 0 : index
      %c0_13 = arith.constant 0 : index
      %24 = vector.load %arg3[%c0_12, %c0_13] : memref<16x32xbf16, #tpu.memory_space<vmem>>, vector<16x32xbf16>
      %25 = arith.extf %24 : vector<16x32xbf16> to vector<16x32xf32>
      %cst_14 = arith.constant dense<0.000000e+00> : vector<16xf32>
      %26 = vector.multi_reduction <add>, %25, %cst_14 [1] : vector<16x32xf32> to vector<16xf32>
      %27 = vector.shape_cast %26 : vector<16xf32> to vector<16x1xf32>
      %cst_15 = arith.constant 3.200000e+01 : f32
      %28 = vector.broadcast %cst_15 : f32 to vector<16x1xf32>
      %29 = arith.divf %27, %28 : vector<16x1xf32>
      %30 = vector.broadcast %29 : vector<16x1xf32> to vector<16x32xf32>
      %31 = arith.subf %25, %30 : vector<16x32xf32>
      %32 = arith.mulf %31, %31 : vector<16x32xf32>
      %cst_16 = arith.constant dense<0.000000e+00> : vector<16xf32>
      %33 = vector.multi_reduction <add>, %32, %cst_16 [1] : vector<16x32xf32> to vector<16xf32>
      %34 = vector.shape_cast %33 : vector<16xf32> to vector<16x1xf32>
      %cst_17 = arith.constant 3.200000e+01 : f32
      %35 = vector.broadcast %cst_17 : f32 to vector<16x1xf32>
      %36 = arith.divf %34, %35 : vector<16x1xf32>
      %37 = vector.broadcast %29 : vector<16x1xf32> to vector<16x32xf32>
      %38 = arith.subf %25, %37 : vector<16x32xf32>
      %cst_18 = arith.constant 9.99999974E-6 : f32
      %39 = vector.broadcast %cst_18 : f32 to vector<16x1xf32>
      %40 = arith.addf %36, %39 : vector<16x1xf32>
      %41 = math.rsqrt %40 : vector<16x1xf32>
      %42 = vector.broadcast %41 : vector<16x1xf32> to vector<16x32xf32>
      %43 = arith.mulf %38, %42 : vector<16x32xf32>
      %c0_19 = arith.constant 0 : index
      %c0_20 = arith.constant 0 : index
      %44 = vector.load %arg6[%c0_19, %c0_20] : memref<1x32xf32, #tpu.memory_space<vmem>>, vector<1x32xf32>
      %45 = vector.broadcast %44 : vector<1x32xf32> to vector<16x32xf32>
      %46 = arith.mulf %43, %45 : vector<16x32xf32>
      %c0_21 = arith.constant 0 : index
      %c0_22 = arith.constant 0 : index
      %47 = vector.load %arg7[%c0_21, %c0_22] : memref<1x32xf32, #tpu.memory_space<vmem>>, vector<1x32xf32>
      %48 = vector.broadcast %47 : vector<1x32xf32> to vector<16x32xf32>
      %49 = arith.addf %46, %48 : vector<16x32xf32>
      %50 = arith.truncf %49 : vector<16x32xf32> to vector<16x32xbf16>
      %c0_23 = arith.constant 0 : index
      %c0_24 = arith.constant 0 : index
      %51 = vector.load %arg9[%c0_23, %c0_24] : memref<16x32xbf16, #tpu.memory_space<vmem>>, vector<16x32xbf16>
      tpu.vector_store %arg9[%c0_23, %c0_24], %50 {strides = array<i32>} : memref<16x32xbf16, #tpu.memory_space<vmem>>, vector<16x32xbf16>,
    } else {
    }
    %c0 = arith.constant 0 : index
    %c0_1 = arith.constant 0 : index
    %3 = vector.load %arg9[%c0, %c0_1] : memref<16x32xbf16, #tpu.memory_space<vmem>>, vector<16x32xbf16>
    %c0_2 = arith.constant 0 : index
    %c0_3 = arith.constant 0 : index
    %4 = vector.load %arg4[%c0_2, %c0_3] : memref<32x128xbf16, #tpu.memory_space<vmem>>, vector<32x128xbf16>
    %cst = arith.constant dense<0.000000e+00> : vector<16x128xf32>
    %5 = tpu.matmul %3, %4, %cst {dimension_numbers = #tpu.dot_dimension_numbers<[1], [0], [0], [1], [0, 0, 1, 1], [], []>} : vector<16x32xbf16>, vector<32x128xbf16>, vector<16x128xf32> -> vector<16x128xf32>
    %c0_4 = arith.constant 0 : index
    %c0_5 = arith.constant 0 : index
    %6 = vector.load %arg5[%c0_4, %c0_5] : memref<1x128xf32, #tpu.memory_space<vmem>>, vector<1x128xf32>
    %7 = vector.broadcast %6 : vector<1x128xf32> to vector<16x128xf32>
    %8 = arith.addf %5, %7 : vector<16x128xf32>
    %cst_6 = arith.constant 5.000000e-01 : f32
    %9 = vector.broadcast %cst_6 : f32 to vector<16x128xf32>
    %10 = arith.mulf %9, %8 : vector<16x128xf32>
    %cst_7 = arith.constant 4.471500e-02 : f32
    %11 = vector.broadcast %cst_7 : f32 to vector<16x128xf32>
    %12 = arith.mulf %11, %8 : vector<16x128xf32>
    %13 = arith.mulf %12, %8 : vector<16x128xf32>
    %14 = arith.mulf %13, %8 : vector<16x128xf32>
    %15 = arith.addf %8, %14 : vector<16x128xf32>
    %cst_8 = arith.constant 0.797884583 : f32
    %16 = vector.broadcast %cst_8 : f32 to vector<16x128xf32>
    %17 = arith.mulf %16, %15 : vector<16x128xf32>
    %18 = math.tanh %17 : vector<16x128xf32>
    %cst_9 = arith.constant 1.000000e+00 : f32
    %19 = vector.broadcast %cst_9 : f32 to vector<16x128xf32>
    %20 = arith.addf %19, %18 : vector<16x128xf32>
    %21 = arith.mulf %10, %20 : vector<16x128xf32>
    %22 = arith.truncf %21 : vector<16x128xf32> to vector<16x128xbf16>
    %c0_10 = arith.constant 0 : index
    %c0_11 = arith.constant 0 : index
    %23 = vector.load %arg8[%c0_10, %c0_11] : memref<16x128xbf16, #tpu.memory_space<vmem>>, vector<16x128xbf16>
    tpu.vector_store %arg8[%c0_10, %c0_11], %22 {strides = array<i32>} : memref<16x128xbf16, #tpu.memory_space<vmem>>, vector<16x128xbf16>,
    return
  }
  func.func @transform_0(%arg0: i32, %arg1: i32, %arg2: i32) -> (i32, i32) {
    %c0_i32 = arith.constant 0 : i32
    return %arg0, %arg2 : i32, i32
  }
  func.func @transform_1(%arg0: i32, %arg1: i32, %arg2: i32) -> (i32, i32) {
    %c0_i32 = arith.constant 0 : i32
    return %arg2, %arg1 : i32, i32
  }
  func.func @transform_2(%arg0: i32, %arg1: i32, %arg2: i32) -> (i32, i32) {
    %c0_i32 = arith.constant 0 : i32
    %c0_i32_0 = arith.constant 0 : i32
    return %c0_i32, %arg1 : i32, i32
  }
  func.func @transform_3(%arg0: i32, %arg1: i32, %arg2: i32) -> (i32, i32) {
    %c0_i32 = arith.constant 0 : i32
    %c0_i32_0 = arith.constant 0 : i32
    %c0_i32_1 = arith.constant 0 : i32
    return %c0_i32, %c0_i32_0 : i32, i32
  }
  func.func @transform_4(%arg0: i32, %arg1: i32, %arg2: i32) -> (i32, i32) {
    %c0_i32 = arith.constant 0 : i32
    %c0_i32_0 = arith.constant 0 : i32
    %c0_i32_1 = arith.constant 0 : i32
    return %c0_i32, %c0_i32_0 : i32, i32
  }
  func.func @transform_5(%arg0: i32, %arg1: i32, %arg2: i32) -> (i32, i32) {
    %c0_i32 = arith.constant 0 : i32
    return %arg0, %arg1 : i32, i32
  }
}

module attributes {stable_mosaic.version = 11 : i64} {
  func.func @_fused_matmul_kernel(%arg0: i32, %arg1: i32, %arg2: i32, %arg3: memref<16x32xbf16, #tpu.memory_space<vmem>>, %arg4: memref<32x96xbf16, #tpu.memory_space<vmem>>, %arg5: memref<1x96xf32, #tpu.memory_space<vmem>>, %arg6: memref<1x32xf32, #tpu.memory_space<vmem>>, %arg7: memref<1x32xf32, #tpu.memory_space<vmem>>, %arg8: memref<16x96xbf16, #tpu.memory_space<vmem>>, %arg9: memref<16x32xbf16, #tpu.memory_space<vmem>>) attributes {dimension_semantics = [#tpu.dimension_semantics<parallel>, #tpu.dimension_semantics<arbitrary>, #tpu.dimension_semantics<arbitrary>], iteration_bounds = array<i64: 1, 1, 1>, scalar_prefetch = 0 : i64, scratch_operands = 1 : i64, tpu.core_type = #tpu.core_type<tc>, window_params = [{transform_indices = @transform_0, window_bounds = array<i64: 16, 32>}, {transform_indices = @transform_1, window_bounds = array<i64: 32, 96>}, {transform_indices = @transform_2, window_bounds = array<i64: 1, 96>}, {pipeline_mode = #tpu.pipeline_mode<synchronous>, transform_indices = @transform_3, window_bounds = array<i64: 1, 32>}, {pipeline_mode = #tpu.pipeline_mode<synchronous>, transform_indices = @transform_4, window_bounds = array<i64: 1, 32>}, {transform_indices = @transform_5, window_bounds = array<i64: 16, 96>}]} {
    %c0_i32 = arith.constant 0 : i32
    %0 = arith.cmpi eq, %arg1, %c0_i32 : i32
    %1 = arith.extui %0 : i1 to i32
    %c0_i32_0 = arith.constant 0 : i32
    %2 = arith.cmpi ne, %1, %c0_i32_0 : i32
    scf.if %2 {
      %c0_8 = arith.constant 0 : index
      %c0_9 = arith.constant 0 : index
      %11 = vector.load %arg3[%c0_8, %c0_9] : memref<16x32xbf16, #tpu.memory_space<vmem>>, vector<16x32xbf16>
      %12 = arith.extf %11 : vector<16x32xbf16> to vector<16x32xf32>
      %cst_10 = arith.constant dense<0.000000e+00> : vector<16xf32>
      %13 = vector.multi_reduction <add>, %12, %cst_10 [1] : vector<16x32xf32> to vector<16xf32>
      %14 = vector.shape_cast %13 : vector<16xf32> to vector<16x1xf32>
      %cst_11 = arith.constant 3.200000e+01 : f32
      %15 = vector.broadcast %cst_11 : f32 to vector<16x1xf32>
      %16 = arith.divf %14, %15 : vector<16x1xf32>
      %17 = vector.broadcast %16 : vector<16x1xf32> to vector<16x32xf32>
      %18 = arith.subf %12, %17 : vector<16x32xf32>
      %19 = arith.mulf %18, %18 : vector<16x32xf32>
      %cst_12 = arith.constant dense<0.000000e+00> : vector<16xf32>
      %20 = vector.multi_reduction <add>, %19, %cst_12 [1] : vector<16x32xf32> to vector<16xf32>
      %21 = vector.shape_cast %20 : vector<16xf32> to vector<16x1xf32>
      %cst_13 = arith.constant 3.200000e+01 : f32
      %22 = vector.broadcast %cst_13 : f32 to vector<16x1xf32>
      %23 = arith.divf %21, %22 : vector<16x1xf32>
      %24 = vector.broadcast %16 : vector<16x1xf32> to vector<16x32xf32>
      %25 = arith.subf %12, %24 : vector<16x32xf32>
      %cst_14 = arith.constant 9.99999974E-6 : f32
      %26 = vector.broadcast %cst_14 : f32 to vector<16x1xf32>
      %27 = arith.addf %23, %26 : vector<16x1xf32>
      %28 = math.rsqrt %27 : vector<16x1xf32>
      %29 = vector.broadcast %28 : vector<16x1xf32> to vector<16x32xf32>
      %30 = arith.mulf %25, %29 : vector<16x32xf32>
      %c0_15 = arith.constant 0 : index
      %c0_16 = arith.constant 0 : index
      %31 = vector.load %arg6[%c0_15, %c0_16] : memref<1x32xf32, #tpu.memory_space<vmem>>, vector<1x32xf32>
      %32 = vector.broadcast %31 : vector<1x32xf32> to vector<16x32xf32>
      %33 = arith.mulf %30, %32 : vector<16x32xf32>
      %c0_17 = arith.constant 0 : index
      %c0_18 = arith.constant 0 : index
      %34 = vector.load %arg7[%c0_17, %c0_18] : memref<1x32xf32, #tpu.memory_space<vmem>>, vector<1x32xf32>
      %35 = vector.broadcast %34 : vector<1x32xf32> to vector<16x32xf32>
      %36 = arith.addf %33, %35 : vector<16x32xf32>
      %37 = arith.truncf %36 : vector<16x32xf32> to vector<16x32xbf16>
      %c0_19 = arith.constant 0 : index
      %c0_20 = arith.constant 0 : index
      %38 = vector.load %arg9[%c0_19, %c0_20] : memref<16x32xbf16, #tpu.memory_space<vmem>>, vector<16x32xbf16>
      tpu.vector_store %arg9[%c0_19, %c0_20], %37 {strides = array<i32>} : memref<16x32xbf16, #tpu.memory_space<vmem>>, vector<16x32xbf16>,
    } else {
    }
    %c0 = arith.constant 0 : index
    %c0_1 = arith.constant 0 : index
    %3 = vector.load %arg9[%c0, %c0_1] : memref<16x32xbf16, #tpu.memory_space<vmem>>, vector<16x32xbf16>
    %c0_2 = arith.constant 0 : index
    %c0_3 = arith.constant 0 : index
    %4 = vector.load %arg4[%c0_2, %c0_3] : memref<32x96xbf16, #tpu.memory_space<vmem>>, vector<32x96xbf16>
    %cst = arith.constant dense<0.000000e+00> : vector<16x96xf32>
    %5 = tpu.matmul %3, %4, %cst {dimension_numbers = #tpu.dot_dimension_numbers<[1], [0], [0], [1], [0, 0, 1, 1], [], []>} : vector<16x32xbf16>, vector<32x96xbf16>, vector<16x96xf32> -> vector<16x96xf32>
    %c0_4 = arith.constant 0 : index
    %c0_5 = arith.constant 0 : index
    %6 = vector.load %arg5[%c0_4, %c0_5] : memref<1x96xf32, #tpu.memory_space<vmem>>, vector<1x96xf32>
    %7 = vector.broadcast %6 : vector<1x96xf32> to vector<16x96xf32>
    %8 = arith.addf %5, %7 : vector<16x96xf32>
    %9 = arith.truncf %8 : vector<16x96xf32> to vector<16x96xbf16>
    %c0_6 = arith.constant 0 : index
    %c0_7 = arith.constant 0 : index
    %10 = vector.load %arg8[%c0_6, %c0_7] : memref<16x96xbf16, #tpu.memory_space<vmem>>, vector<16x96xbf16>
    tpu.vector_store %arg8[%c0_6, %c0_7], %9 {strides = array<i32>} : memref<16x96xbf16, #tpu.memory_space<vmem>>, vector<16x96xbf16>,
    return
  }
  func.func @transform_0(%arg0: i32, %arg1: i32, %arg2: i32) -> (i32, i32) {
    %c0_i32 = arith.constant 0 : i32
    return %arg0, %arg2 : i32, i32
  }
  func.func @transform_1(%arg0: i32, %arg1: i32, %arg2: i32) -> (i32, i32) {
    %c0_i32 = arith.constant 0 : i32
    return %arg2, %arg1 : i32, i32
  }
  func.func @transform_2(%arg0: i32, %arg1: i32, %arg2: i32) -> (i32, i32) {
    %c0_i32 = arith.constant 0 : i32
    %c0_i32_0 = arith.constant 0 : i32
    return %c0_i32, %arg1 : i32, i32
  }
  func.func @transform_3(%arg0: i32, %arg1: i32, %arg2: i32) -> (i32, i32) {
    %c0_i32 = arith.constant 0 : i32
    %c0_i32_0 = arith.constant 0 : i32
    %c0_i32_1 = arith.constant 0 : i32
    return %c0_i32, %c0_i32_0 : i32, i32
  }
  func.func @transform_4(%arg0: i32, %arg1: i32, %arg2: i32) -> (i32, i32) {
    %c0_i32 = arith.constant 0 : i32
    %c0_i32_0 = arith.constant 0 : i32
    %c0_i32_1 = arith.constant 0 : i32
    return %c0_i32, %c0_i32_0 : i32, i32
  }
  func.func @transform_5(%arg0: i32, %arg1: i32, %arg2: i32) -> (i32, i32) {
    %c0_i32 = arith.constant 0 : i32
    return %arg0, %arg1 : i32, i32
  }
}

module attributes {stable_mosaic.version = 11 : i64} {
  func.func @_fused_matmul_kernel(%arg0: i32, %arg1: i32, %arg2: i32, %arg3: memref<16x32xbf16, #tpu.memory_space<vmem>>, %arg4: memref<32x32xbf16, #tpu.memory_space<vmem>>, %arg5: memref<1x32xf32, #tpu.memory_space<vmem>>, %arg6: memref<16x32xbf16, #tpu.memory_space<vmem>>, %arg7: memref<16x32xbf16, #tpu.memory_space<vmem>>) attributes {dimension_semantics = [#tpu.dimension_semantics<parallel>, #tpu.dimension_semantics<parallel>, #tpu.dimension_semantics<arbitrary>], iteration_bounds = array<i64: 1, 1, 1>, scalar_prefetch = 0 : i64, scratch_operands = 0 : i64, tpu.core_type = #tpu.core_type<tc>, window_params = [{transform_indices = @transform_0, window_bounds = array<i64: 16, 32>}, {transform_indices = @transform_1, window_bounds = array<i64: 32, 32>}, {transform_indices = @transform_2, window_bounds = array<i64: 1, 32>}, {transform_indices = @transform_3, window_bounds = array<i64: 16, 32>}, {transform_indices = @transform_4, window_bounds = array<i64: 16, 32>}]} {
    %c0 = arith.constant 0 : index
    %c0_0 = arith.constant 0 : index
    %0 = vector.load %arg3[%c0, %c0_0] : memref<16x32xbf16, #tpu.memory_space<vmem>>, vector<16x32xbf16>
    %c0_1 = arith.constant 0 : index
    %c0_2 = arith.constant 0 : index
    %1 = vector.load %arg4[%c0_1, %c0_2] : memref<32x32xbf16, #tpu.memory_space<vmem>>, vector<32x32xbf16>
    %cst = arith.constant dense<0.000000e+00> : vector<16x32xf32>
    %2 = tpu.matmul %0, %1, %cst {dimension_numbers = #tpu.dot_dimension_numbers<[1], [0], [0], [1], [0, 0, 1, 1], [], []>} : vector<16x32xbf16>, vector<32x32xbf16>, vector<16x32xf32> -> vector<16x32xf32>
    %c0_3 = arith.constant 0 : index
    %c0_4 = arith.constant 0 : index
    %3 = vector.load %arg5[%c0_3, %c0_4] : memref<1x32xf32, #tpu.memory_space<vmem>>, vector<1x32xf32>
    %4 = vector.broadcast %3 : vector<1x32xf32> to vector<16x32xf32>
    %5 = arith.addf %2, %4 : vector<16x32xf32>
    %c0_5 = arith.constant 0 : index
    %c0_6 = arith.constant 0 : index
    %6 = vector.load %arg6[%c0_5, %c0_6] : memref<16x32xbf16, #tpu.memory_space<vmem>>, vector<16x32xbf16>
    %7 = arith.extf %6 : vector<16x32xbf16> to vector<16x32xf32>
    %8 = arith.addf %5, %7 : vector<16x32xf32>
    %9 = arith.truncf %8 : vector<16x32xf32> to vector<16x32xbf16>
    %c0_7 = arith.constant 0 : index
    %c0_8 = arith.constant 0 : index
    %10 = vector.load %arg7[%c0_7, %c0_8] : memref<16x32xbf16, #tpu.memory_space<vmem>>, vector<16x32xbf16>
    tpu.vector_store %arg7[%c0_7, %c0_8], %9 {strides = array<i32>} : memref<16x32xbf16, #tpu.memory_space<vmem>>, vector<16x32xbf16>,
    return
  }
  func.func @transform_0(%arg0: i32, %arg1: i32, %arg2: i32) -> (i32, i32) {
    %c0_i32 = arith.constant 0 : i32
    return %arg0, %arg2 : i32, i32
  }
  func.func @transform_1(%arg0: i32, %arg1: i32, %arg2: i32) -> (i32, i32) {
    %c0_i32 = arith.constant 0 : i32
    return %arg2, %arg1 : i32, i32
  }
  func.func @transform_2(%arg0: i32, %arg1: i32, %arg2: i32) -> (i32, i32) {
    %c0_i32 = arith.constant 0 : i32
    %c0_i32_0 = arith.constant 0 : i32
    return %c0_i32, %arg1 : i32, i32
  }
  func.func @transform_3(%arg0: i32, %arg1: i32, %arg2: i32) -> (i32, i32) {
    %c0_i32 = arith.constant 0 : i32
    return %arg0, %arg1 : i32, i32
  }
  func.func @transform_4(%arg0: i32, %arg1: i32, %arg2: i32) -> (i32, i32) {
    %c0_i32 = arith.constant 0 : i32
    return %arg0, %arg1 : i32, i32
  }
}

module attributes {stable_mosaic.version = 11 : i64} {
  func.func @_flash_attn_kernel(%arg0: i32, %arg1: i32, %arg2: i32, %arg3: memref<1x8x32xbf16, #tpu.memory_space<vmem>>, %arg4: memref<1x8x32xbf16, #tpu.memory_space<vmem>>, %arg5: memref<1x8x32xbf16, #tpu.memory_space<vmem>>, %arg6: memref<1x8x32xbf16, #tpu.memory_space<vmem>>, %arg7: memref<4x8x1xf32, #tpu.memory_space<vmem>>, %arg8: memref<4x8x1xf32, #tpu.memory_space<vmem>>, %arg9: memref<4x8x8xf32, #tpu.memory_space<vmem>>) attributes {dimension_semantics = [#tpu.dimension_semantics<parallel>, #tpu.dimension_semantics<parallel>, #tpu.dimension_semantics<arbitrary>], iteration_bounds = array<i64: 2, 1, 1>, scalar_prefetch = 0 : i64, scratch_operands = 3 : i64, tpu.core_type = #tpu.core_type<tc>, window_params = [{transform_indices = @transform_0, window_bounds = array<i64: 1, 8, 32>}, {transform_indices = @transform_1, window_bounds = array<i64: 1, 8, 32>}, {transform_indices = @transform_2, window_bounds = array<i64: 1, 8, 32>}, {transform_indices = @transform_3, window_bounds = array<i64: 1, 8, 32>}]} {
    %c0_i32 = arith.constant 0 : i32
    %0 = arith.cmpi eq, %arg2, %c0_i32 : i32
    %1 = arith.extui %0 : i1 to i32
    %c0_i32_0 = arith.constant 0 : i32
    %2 = arith.cmpi ne, %1, %c0_i32_0 : i32
    scf.if %2 {
      %cst = arith.constant -1.000000e+30 : f32
      %9 = vector.broadcast %cst : f32 to vector<4x8x1xf32>
      %c0 = arith.constant 0 : index
      %c0_3 = arith.constant 0 : index
      %c0_4 = arith.constant 0 : index
      %10 = vector.load %arg7[%c0, %c0_3, %c0_4] : memref<4x8x1xf32, #tpu.memory_space<vmem>>, vector<4x8x1xf32>
      tpu.vector_store %arg7[%c0, %c0_3, %c0_4], %9 {strides = array<i32>} : memref<4x8x1xf32, #tpu.memory_space<vmem>>, vector<4x8x1xf32>,
      %cst_5 = arith.constant 0.000000e+00 : f32
      %11 = vector.broadcast %cst_5 : f32 to vector<4x8x1xf32>
      %c0_6 = arith.constant 0 : index
      %c0_7 = arith.constant 0 : index
      %c0_8 = arith.constant 0 : index
      %12 = vector.load %arg8[%c0_6, %c0_7, %c0_8] : memref<4x8x1xf32, #tpu.memory_space<vmem>>, vector<4x8x1xf32>
      tpu.vector_store %arg8[%c0_6, %c0_7, %c0_8], %11 {strides = array<i32>} : memref<4x8x1xf32, #tpu.memory_space<vmem>>, vector<4x8x1xf32>,
      %cst_9 = arith.constant 0.000000e+00 : f32
      %13 = vector.broadcast %cst_9 : f32 to vector<4x8x8xf32>
      %c0_10 = arith.constant 0 : index
      %c0_11 = arith.constant 0 : index
      %c0_12 = arith.constant 0 : index
      %14 = vector.load %arg9[%c0_10, %c0_11, %c0_12] : memref<4x8x8xf32, #tpu.memory_space<vmem>>, vector<4x8x8xf32>
      tpu.vector_store %arg9[%c0_10, %c0_11, %c0_12], %13 {strides = array<i32>} : memref<4x8x8xf32, #tpu.memory_space<vmem>>, vector<4x8x8xf32>,
    } else {
    }
    %3 = arith.cmpi sle, %arg2, %arg1 : i32
    %4 = arith.extui %3 : i1 to i32
    %c0_i32_1 = arith.constant 0 : i32
    %5 = arith.cmpi ne, %4, %c0_i32_1 : i32
    scf.if %5 {
      %c0 = arith.constant 0 : index
      %c0_3 = arith.constant 0 : index
      %c0_4 = arith.constant 0 : index
      %9 = vector.load %arg3[%c0, %c0_3, %c0_4] : memref<1x8x32xbf16, #tpu.memory_space<vmem>>, vector<1x8x32xbf16>
      %10 = vector.shape_cast %9 : vector<1x8x32xbf16> to vector<8x32xbf16>
      %c0_5 = arith.constant 0 : index
      %c0_6 = arith.constant 0 : index
      %c0_7 = arith.constant 0 : index
      %11 = vector.load %arg4[%c0_5, %c0_6, %c0_7] : memref<1x8x32xbf16, #tpu.memory_space<vmem>>, vector<1x8x32xbf16>
      %12 = vector.shape_cast %11 : vector<1x8x32xbf16> to vector<8x32xbf16>
      %c0_8 = arith.constant 0 : index
      %c0_9 = arith.constant 0 : index
      %c0_10 = arith.constant 0 : index
      %13 = vector.load %arg5[%c0_8, %c0_9, %c0_10] : memref<1x8x32xbf16, #tpu.memory_space<vmem>>, vector<1x8x32xbf16>
      %14 = vector.shape_cast %13 : vector<1x8x32xbf16> to vector<8x32xbf16>
      %c8_i32 = arith.constant 8 : i32
      %15 = arith.muli %arg1, %c8_i32 : i32
      %16 = tpu.iota {dimensions = array<i32: 0>} : vector<8x8xi32>
      %17 = vector.broadcast %15 : i32 to vector<8x8xi32>
      %18 = arith.addi %17, %16 : vector<8x8xi32>
      %c8_i32_11 = arith.constant 8 : i32
      %19 = arith.muli %arg2, %c8_i32_11 : i32
      %20 = tpu.iota {dimensions = array<i32: 1>} : vector<8x8xi32>
      %21 = vector.broadcast %19 : i32 to vector<8x8xi32>
      %22 = arith.addi %21, %20 : vector<8x8xi32>
      %23 = arith.cmpi sge, %18, %22 : vector<8x8xi32>
      %24 = vector.extract_strided_slice %10 {offsets = [0, 0], sizes = [8, 8], strides = [1, 1]} : vector<8x32xbf16> to vector<8x8xbf16>
      %25 = vector.extract_strided_slice %12 {offsets = [0, 0], sizes = [8, 8], strides = [1, 1]} : vector<8x32xbf16> to vector<8x8xbf16>
      %26 = vector.extract_strided_slice %14 {offsets = [0, 0], sizes = [8, 8], strides = [1, 1]} : vector<8x32xbf16> to vector<8x8xbf16>
      %cst = arith.constant dense<0.000000e+00> : vector<8x8xf32>
      %27 = tpu.matmul %24, %25, %cst {dimension_numbers = #tpu.dot_dimension_numbers<[1], [1], [0], [0], [0, 0, 1, 0], [], []>} : vector<8x8xbf16>, vector<8x8xbf16>, vector<8x8xf32> -> vector<8x8xf32>
      %cst_12 = arith.constant 0.353553385 : f32
      %28 = vector.broadcast %cst_12 : f32 to vector<8x8xf32>
      %29 = arith.mulf %27, %28 : vector<8x8xf32>
      %cst_13 = arith.constant -1.000000e+30 : f32
      %30 = vector.broadcast %cst_13 : f32 to vector<8x8xf32>
      %31 = arith.select %23, %29, %30 : vector<8x8xi1>, vector<8x8xf32>
      %c0_14 = arith.constant 0 : index
      %c0_15 = arith.constant 0 : index
      %c0_16 = arith.constant 0 : index
      %32 = vector.load %arg7[%c0_14, %c0_15, %c0_16] : memref<4x8x1xf32, #tpu.memory_space<vmem>>, vector<1x8x1xf32>
      %33 = vector.shape_cast %32 : vector<1x8x1xf32> to vector<8x1xf32>
      %cst_17 = arith.constant dense<0xFF800000> : vector<8xf32>
      %34 = vector.multi_reduction <maximumf>, %31, %cst_17 [1] : vector<8x8xf32> to vector<8xf32>
      %35 = vector.shape_cast %34 : vector<8xf32> to vector<8x1xf32>
      %36 = arith.maximumf %33, %35 : vector<8x1xf32>
      %37 = arith.subf %33, %36 : vector<8x1xf32>
      %38 = math.exp %37 : vector<8x1xf32>
      %39 = vector.broadcast %36 : vector<8x1xf32> to vector<8x8xf32>
      %40 = arith.subf %31, %39 : vector<8x8xf32>
      %41 = math.exp %40 : vector<8x8xf32>
      %c0_18 = arith.constant 0 : index
      %c0_19 = arith.constant 0 : index
      %c0_20 = arith.constant 0 : index
      %42 = vector.load %arg8[%c0_18, %c0_19, %c0_20] : memref<4x8x1xf32, #tpu.memory_space<vmem>>, vector<1x8x1xf32>
      %43 = vector.shape_cast %42 : vector<1x8x1xf32> to vector<8x1xf32>
      %44 = arith.mulf %38, %43 : vector<8x1xf32>
      %cst_21 = arith.constant dense<0.000000e+00> : vector<8xf32>
      %45 = vector.multi_reduction <add>, %41, %cst_21 [1] : vector<8x8xf32> to vector<8xf32>
      %46 = vector.shape_cast %45 : vector<8xf32> to vector<8x1xf32>
      %47 = arith.addf %44, %46 : vector<8x1xf32>
      %c0_22 = arith.constant 0 : index
      %c0_23 = arith.constant 0 : index
      %c0_24 = arith.constant 0 : index
      %48 = vector.load %arg8[%c0_22, %c0_23, %c0_24] : memref<4x8x1xf32, #tpu.memory_space<vmem>>, vector<1x8x1xf32>
      %49 = vector.shape_cast %48 : vector<1x8x1xf32> to vector<8x1xf32>
      %50 = vector.shape_cast %47 : vector<8x1xf32> to vector<1x8x1xf32>
      tpu.vector_store %arg8[%c0_22, %c0_23, %c0_24], %50 {strides = array<i32>} : memref<4x8x1xf32, #tpu.memory_space<vmem>>, vector<1x8x1xf32>,
      %c0_25 = arith.constant 0 : index
      %c0_26 = arith.constant 0 : index
      %c0_27 = arith.constant 0 : index
      %51 = vector.load %arg9[%c0_25, %c0_26, %c0_27] : memref<4x8x8xf32, #tpu.memory_space<vmem>>, vector<1x8x8xf32>
      %52 = vector.shape_cast %51 : vector<1x8x8xf32> to vector<8x8xf32>
      %53 = vector.broadcast %38 : vector<8x1xf32> to vector<8x8xf32>
      %54 = arith.mulf %53, %52 : vector<8x8xf32>
      %55 = arith.truncf %41 : vector<8x8xf32> to vector<8x8xbf16>
      %cst_28 = arith.constant dense<0.000000e+00> : vector<8x8xf32>
      %56 = tpu.matmul %55, %26, %cst_28 {dimension_numbers = #tpu.dot_dimension_numbers<[1], [0], [0], [1], [0, 0, 1, 1], [], []>} : vector<8x8xbf16>, vector<8x8xbf16>, vector<8x8xf32> -> vector<8x8xf32>
      %57 = arith.addf %54, %56 : vector<8x8xf32>
      %c0_29 = arith.constant 0 : index
      %c0_30 = arith.constant 0 : index
      %c0_31 = arith.constant 0 : index
      %58 = vector.load %arg9[%c0_29, %c0_30, %c0_31] : memref<4x8x8xf32, #tpu.memory_space<vmem>>, vector<1x8x8xf32>
      %59 = vector.shape_cast %58 : vector<1x8x8xf32> to vector<8x8xf32>
      %60 = vector.shape_cast %57 : vector<8x8xf32> to vector<1x8x8xf32>
      tpu.vector_store %arg9[%c0_29, %c0_30, %c0_31], %60 {strides = array<i32>} : memref<4x8x8xf32, #tpu.memory_space<vmem>>, vector<1x8x8xf32>,
      %c0_32 = arith.constant 0 : index
      %c0_33 = arith.constant 0 : index
      %c0_34 = arith.constant 0 : index
      %61 = vector.load %arg7[%c0_32, %c0_33, %c0_34] : memref<4x8x1xf32, #tpu.memory_space<vmem>>, vector<1x8x1xf32>
      %62 = vector.shape_cast %61 : vector<1x8x1xf32> to vector<8x1xf32>
      %63 = vector.shape_cast %36 : vector<8x1xf32> to vector<1x8x1xf32>
      tpu.vector_store %arg7[%c0_32, %c0_33, %c0_34], %63 {strides = array<i32>} : memref<4x8x1xf32, #tpu.memory_space<vmem>>, vector<1x8x1xf32>,
      %64 = vector.extract_strided_slice %10 {offsets = [0, 8], sizes = [8, 8], strides = [1, 1]} : vector<8x32xbf16> to vector<8x8xbf16>
      %65 = vector.extract_strided_slice %12 {offsets = [0, 8], sizes = [8, 8], strides = [1, 1]} : vector<8x32xbf16> to vector<8x8xbf16>
      %66 = vector.extract_strided_slice %14 {offsets = [0, 8], sizes = [8, 8], strides = [1, 1]} : vector<8x32xbf16> to vector<8x8xbf16>
      %cst_35 = arith.constant dense<0.000000e+00> : vector<8x8xf32>
      %67 = tpu.matmul %64, %65, %cst_35 {dimension_numbers = #tpu.dot_dimension_numbers<[1], [1], [0], [0], [0, 0, 1, 0], [], []>} : vector<8x8xbf16>, vector<8x8xbf16>, vector<8x8xf32> -> vector<8x8xf32>
      %cst_36 = arith.constant 0.353553385 : f32
      %68 = vector.broadcast %cst_36 : f32 to vector<8x8xf32>
      %69 = arith.mulf %67, %68 : vector<8x8xf32>
      %cst_37 = arith.constant -1.000000e+30 : f32
      %70 = vector.broadcast %cst_37 : f32 to vector<8x8xf32>
      %71 = arith.select %23, %69, %70 : vector<8x8xi1>, vector<8x8xf32>
      %c1 = arith.constant 1 : index
      %c0_38 = arith.constant 0 : index
      %c0_39 = arith.constant 0 : index
      %72 = vector.load %arg7[%c1, %c0_38, %c0_39] : memref<4x8x1xf32, #tpu.memory_space<vmem>>, vector<1x8x1xf32>
      %73 = vector.shape_cast %72 : vector<1x8x1xf32> to vector<8x1xf32>
      %cst_40 = arith.constant dense<0xFF800000> : vector<8xf32>
      %74 = vector.multi_reduction <maximumf>, %71, %cst_40 [1] : vector<8x8xf32> to vector<8xf32>
      %75 = vector.shape_cast %74 : vector<8xf32> to vector<8x1xf32>
      %76 = arith.maximumf %73, %75 : vector<8x1xf32>
      %77 = arith.subf %73, %76 : vector<8x1xf32>
      %78 = math.exp %77 : vector<8x1xf32>
      %79 = vector.broadcast %76 : vector<8x1xf32> to vector<8x8xf32>
      %80 = arith.subf %71, %79 : vector<8x8xf32>
      %81 = math.exp %80 : vector<8x8xf32>
      %c1_41 = arith.constant 1 : index
      %c0_42 = arith.constant 0 : index
      %c0_43 = arith.constant 0 : index
      %82 = vector.load %arg8[%c1_41, %c0_42, %c0_43] : memref<4x8x1xf32, #tpu.memory_space<vmem>>, vector<1x8x1xf32>
      %83 = vector.shape_cast %82 : vector<1x8x1xf32> to vector<8x1xf32>
      %84 = arith.mulf %78, %83 : vector<8x1xf32>
      %cst_44 = arith.constant dense<0.000000e+00> : vector<8xf32>
      %85 = vector.multi_reduction <add>, %81, %cst_44 [1] : vector<8x8xf32> to vector<8xf32>
      %86 = vector.shape_cast %85 : vector<8xf32> to vector<8x1xf32>
      %87 = arith.addf %84, %86 : vector<8x1xf32>
      %c1_45 = arith.constant 1 : index
      %c0_46 = arith.constant 0 : index
      %c0_47 = arith.constant 0 : index
      %88 = vector.load %arg8[%c1_45, %c0_46, %c0_47] : memref<4x8x1xf32, #tpu.memory_space<vmem>>, vector<1x8x1xf32>
      %89 = vector.shape_cast %88 : vector<1x8x1xf32> to vector<8x1xf32>
      %90 = vector.shape_cast %87 : vector<8x1xf32> to vector<1x8x1xf32>
      tpu.vector_store %arg8[%c1_45, %c0_46, %c0_47], %90 {strides = array<i32>} : memref<4x8x1xf32, #tpu.memory_space<vmem>>, vector<1x8x1xf32>,
      %c1_48 = arith.constant 1 : index
      %c0_49 = arith.constant 0 : index
      %c0_50 = arith.constant 0 : index
      %91 = vector.load %arg9[%c1_48, %c0_49, %c0_50] : memref<4x8x8xf32, #tpu.memory_space<vmem>>, vector<1x8x8xf32>
      %92 = vector.shape_cast %91 : vector<1x8x8xf32> to vector<8x8xf32>
      %93 = vector.broadcast %78 : vector<8x1xf32> to vector<8x8xf32>
      %94 = arith.mulf %93, %92 : vector<8x8xf32>
      %95 = arith.truncf %81 : vector<8x8xf32> to vector<8x8xbf16>
      %cst_51 = arith.constant dense<0.000000e+00> : vector<8x8xf32>
      %96 = tpu.matmul %95, %66, %cst_51 {dimension_numbers = #tpu.dot_dimension_numbers<[1], [0], [0], [1], [0, 0, 1, 1], [], []>} : vector<8x8xbf16>, vector<8x8xbf16>, vector<8x8xf32> -> vector<8x8xf32>
      %97 = arith.addf %94, %96 : vector<8x8xf32>
      %c1_52 = arith.constant 1 : index
      %c0_53 = arith.constant 0 : index
      %c0_54 = arith.constant 0 : index
      %98 = vector.load %arg9[%c1_52, %c0_53, %c0_54] : memref<4x8x8xf32, #tpu.memory_space<vmem>>, vector<1x8x8xf32>
      %99 = vector.shape_cast %98 : vector<1x8x8xf32> to vector<8x8xf32>
      %100 = vector.shape_cast %97 : vector<8x8xf32> to vector<1x8x8xf32>
      tpu.vector_store %arg9[%c1_52, %c0_53, %c0_54], %100 {strides = array<i32>} : memref<4x8x8xf32, #tpu.memory_space<vmem>>, vector<1x8x8xf32>,
      %c1_55 = arith.constant 1 : index
      %c0_56 = arith.constant 0 : index
      %c0_57 = arith.constant 0 : index
      %101 = vector.load %arg7[%c1_55, %c0_56, %c0_57] : memref<4x8x1xf32, #tpu.memory_space<vmem>>, vector<1x8x1xf32>
      %102 = vector.shape_cast %101 : vector<1x8x1xf32> to vector<8x1xf32>
      %103 = vector.shape_cast %76 : vector<8x1xf32> to vector<1x8x1xf32>
      tpu.vector_store %arg7[%c1_55, %c0_56, %c0_57], %103 {strides = array<i32>} : memref<4x8x1xf32, #tpu.memory_space<vmem>>, vector<1x8x1xf32>,
      %104 = vector.extract_strided_slice %10 {offsets = [0, 16], sizes = [8, 8], strides = [1, 1]} : vector<8x32xbf16> to vector<8x8xbf16>
      %105 = vector.extract_strided_slice %12 {offsets = [0, 16], sizes = [8, 8], strides = [1, 1]} : vector<8x32xbf16> to vector<8x8xbf16>
      %106 = vector.extract_strided_slice %14 {offsets = [0, 16], sizes = [8, 8], strides = [1, 1]} : vector<8x32xbf16> to vector<8x8xbf16>
      %cst_58 = arith.constant dense<0.000000e+00> : vector<8x8xf32>
      %107 = tpu.matmul %104, %105, %cst_58 {dimension_numbers = #tpu.dot_dimension_numbers<[1], [1], [0], [0], [0, 0, 1, 0], [], []>} : vector<8x8xbf16>, vector<8x8xbf16>, vector<8x8xf32> -> vector<8x8xf32>
      %cst_59 = arith.constant 0.353553385 : f32
      %108 = vector.broadcast %cst_59 : f32 to vector<8x8xf32>
      %109 = arith.mulf %107, %108 : vector<8x8xf32>
      %cst_60 = arith.constant -1.000000e+30 : f32
      %110 = vector.broadcast %cst_60 : f32 to vector<8x8xf32>
      %111 = arith.select %23, %109, %110 : vector<8x8xi1>, vector<8x8xf32>
      %c2 = arith.constant 2 : index
      %c0_61 = arith.constant 0 : index
      %c0_62 = arith.constant 0 : index
      %112 = vector.load %arg7[%c2, %c0_61, %c0_62] : memref<4x8x1xf32, #tpu.memory_space<vmem>>, vector<1x8x1xf32>
      %113 = vector.shape_cast %112 : vector<1x8x1xf32> to vector<8x1xf32>
      %cst_63 = arith.constant dense<0xFF800000> : vector<8xf32>
      %114 = vector.multi_reduction <maximumf>, %111, %cst_63 [1] : vector<8x8xf32> to vector<8xf32>
      %115 = vector.shape_cast %114 : vector<8xf32> to vector<8x1xf32>
      %116 = arith.maximumf %113, %115 : vector<8x1xf32>
      %117 = arith.subf %113, %116 : vector<8x1xf32>
      %118 = math.exp %117 : vector<8x1xf32>
      %119 = vector.broadcast %116 : vector<8x1xf32> to vector<8x8xf32>
      %120 = arith.subf %111, %119 : vector<8x8xf32>
      %121 = math.exp %120 : vector<8x8xf32>
      %c2_64 = arith.constant 2 : index
      %c0_65 = arith.constant 0 : index
      %c0_66 = arith.constant 0 : index
      %122 = vector.load %arg8[%c2_64, %c0_65, %c0_66] : memref<4x8x1xf32, #tpu.memory_space<vmem>>, vector<1x8x1xf32>
      %123 = vector.shape_cast %122 : vector<1x8x1xf32> to vector<8x1xf32>
      %124 = arith.mulf %118, %123 : vector<8x1xf32>
      %cst_67 = arith.constant dense<0.000000e+00> : vector<8xf32>
      %125 = vector.multi_reduction <add>, %121, %cst_67 [1] : vector<8x8xf32> to vector<8xf32>
      %126 = vector.shape_cast %125 : vector<8xf32> to vector<8x1xf32>
      %127 = arith.addf %124, %126 : vector<8x1xf32>
      %c2_68 = arith.constant 2 : index
      %c0_69 = arith.constant 0 : index
      %c0_70 = arith.constant 0 : index
      %128 = vector.load %arg8[%c2_68, %c0_69, %c0_70] : memref<4x8x1xf32, #tpu.memory_space<vmem>>, vector<1x8x1xf32>
      %129 = vector.shape_cast %128 : vector<1x8x1xf32> to vector<8x1xf32>
      %130 = vector.shape_cast %127 : vector<8x1xf32> to vector<1x8x1xf32>
      tpu.vector_store %arg8[%c2_68, %c0_69, %c0_70], %130 {strides = array<i32>} : memref<4x8x1xf32, #tpu.memory_space<vmem>>, vector<1x8x1xf32>,
      %c2_71 = arith.constant 2 : index
      %c0_72 = arith.constant 0 : index
      %c0_73 = arith.constant 0 : index
      %131 = vector.load %arg9[%c2_71, %c0_72, %c0_73] : memref<4x8x8xf32, #tpu.memory_space<vmem>>, vector<1x8x8xf32>
      %132 = vector.shape_cast %131 : vector<1x8x8xf32> to vector<8x8xf32>
      %133 = vector.broadcast %118 : vector<8x1xf32> to vector<8x8xf32>
      %134 = arith.mulf %133, %132 : vector<8x8xf32>
      %135 = arith.truncf %121 : vector<8x8xf32> to vector<8x8xbf16>
      %cst_74 = arith.constant dense<0.000000e+00> : vector<8x8xf32>
      %136 = tpu.matmul %135, %106, %cst_74 {dimension_numbers = #tpu.dot_dimension_numbers<[1], [0], [0], [1], [0, 0, 1, 1], [], []>} : vector<8x8xbf16>, vector<8x8xbf16>, vector<8x8xf32> -> vector<8x8xf32>
      %137 = arith.addf %134, %136 : vector<8x8xf32>
      %c2_75 = arith.constant 2 : index
      %c0_76 = arith.constant 0 : index
      %c0_77 = arith.constant 0 : index
      %138 = vector.load %arg9[%c2_75, %c0_76, %c0_77] : memref<4x8x8xf32, #tpu.memory_space<vmem>>, vector<1x8x8xf32>
      %139 = vector.shape_cast %138 : vector<1x8x8xf32> to vector<8x8xf32>
      %140 = vector.shape_cast %137 : vector<8x8xf32> to vector<1x8x8xf32>
      tpu.vector_store %arg9[%c2_75, %c0_76, %c0_77], %140 {strides = array<i32>} : memref<4x8x8xf32, #tpu.memory_space<vmem>>, vector<1x8x8xf32>,
      %c2_78 = arith.constant 2 : index
      %c0_79 = arith.constant 0 : index
      %c0_80 = arith.constant 0 : index
      %141 = vector.load %arg7[%c2_78, %c0_79, %c0_80] : memref<4x8x1xf32, #tpu.memory_space<vmem>>, vector<1x8x1xf32>
      %142 = vector.shape_cast %141 : vector<1x8x1xf32> to vector<8x1xf32>
      %143 = vector.shape_cast %116 : vector<8x1xf32> to vector<1x8x1xf32>
      tpu.vector_store %arg7[%c2_78, %c0_79, %c0_80], %143 {strides = array<i32>} : memref<4x8x1xf32, #tpu.memory_space<vmem>>, vector<1x8x1xf32>,
      %144 = vector.extract_strided_slice %10 {offsets = [0, 24], sizes = [8, 8], strides = [1, 1]} : vector<8x32xbf16> to vector<8x8xbf16>
      %145 = vector.extract_strided_slice %12 {offsets = [0, 24], sizes = [8, 8], strides = [1, 1]} : vector<8x32xbf16> to vector<8x8xbf16>
      %146 = vector.extract_strided_slice %14 {offsets = [0, 24], sizes = [8, 8], strides = [1, 1]} : vector<8x32xbf16> to vector<8x8xbf16>
      %cst_81 = arith.constant dense<0.000000e+00> : vector<8x8xf32>
      %147 = tpu.matmul %144, %145, %cst_81 {dimension_numbers = #tpu.dot_dimension_numbers<[1], [1], [0], [0], [0, 0, 1, 0], [], []>} : vector<8x8xbf16>, vector<8x8xbf16>, vector<8x8xf32> -> vector<8x8xf32>
      %cst_82 = arith.constant 0.353553385 : f32
      %148 = vector.broadcast %cst_82 : f32 to vector<8x8xf32>
      %149 = arith.mulf %147, %148 : vector<8x8xf32>
      %cst_83 = arith.constant -1.000000e+30 : f32
      %150 = vector.broadcast %cst_83 : f32 to vector<8x8xf32>
      %151 = arith.select %23, %149, %150 : vector<8x8xi1>, vector<8x8xf32>
      %c3 = arith.constant 3 : index
      %c0_84 = arith.constant 0 : index
      %c0_85 = arith.constant 0 : index
      %152 = vector.load %arg7[%c3, %c0_84, %c0_85] : memref<4x8x1xf32, #tpu.memory_space<vmem>>, vector<1x8x1xf32>
      %153 = vector.shape_cast %152 : vector<1x8x1xf32> to vector<8x1xf32>
      %cst_86 = arith.constant dense<0xFF800000> : vector<8xf32>
      %154 = vector.multi_reduction <maximumf>, %151, %cst_86 [1] : vector<8x8xf32> to vector<8xf32>
      %155 = vector.shape_cast %154 : vector<8xf32> to vector<8x1xf32>
      %156 = arith.maximumf %153, %155 : vector<8x1xf32>
      %157 = arith.subf %153, %156 : vector<8x1xf32>
      %158 = math.exp %157 : vector<8x1xf32>
      %159 = vector.broadcast %156 : vector<8x1xf32> to vector<8x8xf32>
      %160 = arith.subf %151, %159 : vector<8x8xf32>
      %161 = math.exp %160 : vector<8x8xf32>
      %c3_87 = arith.constant 3 : index
      %c0_88 = arith.constant 0 : index
      %c0_89 = arith.constant 0 : index
      %162 = vector.load %arg8[%c3_87, %c0_88, %c0_89] : memref<4x8x1xf32, #tpu.memory_space<vmem>>, vector<1x8x1xf32>
      %163 = vector.shape_cast %162 : vector<1x8x1xf32> to vector<8x1xf32>
      %164 = arith.mulf %158, %163 : vector<8x1xf32>
      %cst_90 = arith.constant dense<0.000000e+00> : vector<8xf32>
      %165 = vector.multi_reduction <add>, %161, %cst_90 [1] : vector<8x8xf32> to vector<8xf32>
      %166 = vector.shape_cast %165 : vector<8xf32> to vector<8x1xf32>
      %167 = arith.addf %164, %166 : vector<8x1xf32>
      %c3_91 = arith.constant 3 : index
      %c0_92 = arith.constant 0 : index
      %c0_93 = arith.constant 0 : index
      %168 = vector.load %arg8[%c3_91, %c0_92, %c0_93] : memref<4x8x1xf32, #tpu.memory_space<vmem>>, vector<1x8x1xf32>
      %169 = vector.shape_cast %168 : vector<1x8x1xf32> to vector<8x1xf32>
      %170 = vector.shape_cast %167 : vector<8x1xf32> to vector<1x8x1xf32>
      tpu.vector_store %arg8[%c3_91, %c0_92, %c0_93], %170 {strides = array<i32>} : memref<4x8x1xf32, #tpu.memory_space<vmem>>, vector<1x8x1xf32>,
      %c3_94 = arith.constant 3 : index
      %c0_95 = arith.constant 0 : index
      %c0_96 = arith.constant 0 : index
      %171 = vector.load %arg9[%c3_94, %c0_95, %c0_96] : memref<4x8x8xf32, #tpu.memory_space<vmem>>, vector<1x8x8xf32>
      %172 = vector.shape_cast %171 : vector<1x8x8xf32> to vector<8x8xf32>
      %173 = vector.broadcast %158 : vector<8x1xf32> to vector<8x8xf32>
      %174 = arith.mulf %173, %172 : vector<8x8xf32>
      %175 = arith.truncf %161 : vector<8x8xf32> to vector<8x8xbf16>
      %cst_97 = arith.constant dense<0.000000e+00> : vector<8x8xf32>
      %176 = tpu.matmul %175, %146, %cst_97 {dimension_numbers = #tpu.dot_dimension_numbers<[1], [0], [0], [1], [0, 0, 1, 1], [], []>} : vector<8x8xbf16>, vector<8x8xbf16>, vector<8x8xf32> -> vector<8x8xf32>
      %177 = arith.addf %174, %176 : vector<8x8xf32>
      %c3_98 = arith.constant 3 : index
      %c0_99 = arith.constant 0 : index
      %c0_100 = arith.constant 0 : index
      %178 = vector.load %arg9[%c3_98, %c0_99, %c0_100] : memref<4x8x8xf32, #tpu.memory_space<vmem>>, vector<1x8x8xf32>
      %179 = vector.shape_cast %178 : vector<1x8x8xf32> to vector<8x8xf32>
      %180 = vector.shape_cast %177 : vector<8x8xf32> to vector<1x8x8xf32>
      tpu.vector_store %arg9[%c3_98, %c0_99, %c0_100], %180 {strides = array<i32>} : memref<4x8x8xf32, #tpu.memory_space<vmem>>, vector<1x8x8xf32>,
      %c3_101 = arith.constant 3 : index
      %c0_102 = arith.constant 0 : index
      %c0_103 = arith.constant 0 : index
      %181 = vector.load %arg7[%c3_101, %c0_102, %c0_103] : memref<4x8x1xf32, #tpu.memory_space<vmem>>, vector<1x8x1xf32>
      %182 = vector.shape_cast %181 : vector<1x8x1xf32> to vector<8x1xf32>
      %183 = vector.shape_cast %156 : vector<8x1xf32> to vector<1x8x1xf32>
      tpu.vector_store %arg7[%c3_101, %c0_102, %c0_103], %183 {strides = array<i32>} : memref<4x8x1xf32, #tpu.memory_space<vmem>>, vector<1x8x1xf32>,
    } else {
    }
    %6 = arith.cmpi eq, %arg2, %arg1 : i32
    %7 = arith.extui %6 : i1 to i32
    %c0_i32_2 = arith.constant 0 : i32
    %8 = arith.cmpi ne, %7, %c0_i32_2 : i32
    scf.if %8 {
      %c0 = arith.constant 0 : index
      %c0_3 = arith.constant 0 : index
      %c0_4 = arith.constant 0 : index
      %9 = vector.load %arg8[%c0, %c0_3, %c0_4] : memref<4x8x1xf32, #tpu.memory_space<vmem>>, vector<1x8x1xf32>
      %10 = vector.shape_cast %9 : vector<1x8x1xf32> to vector<8x1xf32>
      %11 = tpu.reciprocal %10 {approx = true} : vector<8x1xf32> -> vector<8x1xf32>
      %c0_5 = arith.constant 0 : index
      %c0_6 = arith.constant 0 : index
      %c0_7 = arith.constant 0 : index
      %12 = vector.load %arg9[%c0_5, %c0_6, %c0_7] : memref<4x8x8xf32, #tpu.memory_space<vmem>>, vector<1x8x8xf32>
      %13 = vector.shape_cast %12 : vector<1x8x8xf32> to vector<8x8xf32>
      %14 = vector.broadcast %11 : vector<8x1xf32> to vector<8x8xf32>
      %15 = arith.mulf %13, %14 : vector<8x8xf32>
      %c1 = arith.constant 1 : index
      %c0_8 = arith.constant 0 : index
      %c0_9 = arith.constant 0 : index
      %16 = vector.load %arg8[%c1, %c0_8, %c0_9] : memref<4x8x1xf32, #tpu.memory_space<vmem>>, vector<1x8x1xf32>
      %17 = vector.shape_cast %16 : vector<1x8x1xf32> to vector<8x1xf32>
      %18 = tpu.reciprocal %17 {approx = true} : vector<8x1xf32> -> vector<8x1xf32>
      %c1_10 = arith.constant 1 : index
      %c0_11 = arith.constant 0 : index
      %c0_12 = arith.constant 0 : index
      %19 = vector.load %arg9[%c1_10, %c0_11, %c0_12] : memref<4x8x8xf32, #tpu.memory_space<vmem>>, vector<1x8x8xf32>
      %20 = vector.shape_cast %19 : vector<1x8x8xf32> to vector<8x8xf32>
      %21 = vector.broadcast %18 : vector<8x1xf32> to vector<8x8xf32>
      %22 = arith.mulf %20, %21 : vector<8x8xf32>
      %c2 = arith.constant 2 : index
      %c0_13 = arith.constant 0 : index
      %c0_14 = arith.constant 0 : index
      %23 = vector.load %arg8[%c2, %c0_13, %c0_14] : memref<4x8x1xf32, #tpu.memory_space<vmem>>, vector<1x8x1xf32>
      %24 = vector.shape_cast %23 : vector<1x8x1xf32> to vector<8x1xf32>
      %25 = tpu.reciprocal %24 {approx = true} : vector<8x1xf32> -> vector<8x1xf32>
      %c2_15 = arith.constant 2 : index
      %c0_16 = arith.constant 0 : index
      %c0_17 = arith.constant 0 : index
      %26 = vector.load %arg9[%c2_15, %c0_16, %c0_17] : memref<4x8x8xf32, #tpu.memory_space<vmem>>, vector<1x8x8xf32>
      %27 = vector.shape_cast %26 : vector<1x8x8xf32> to vector<8x8xf32>
      %28 = vector.broadcast %25 : vector<8x1xf32> to vector<8x8xf32>
      %29 = arith.mulf %27, %28 : vector<8x8xf32>
      %c3 = arith.constant 3 : index
      %c0_18 = arith.constant 0 : index
      %c0_19 = arith.constant 0 : index
      %30 = vector.load %arg8[%c3, %c0_18, %c0_19] : memref<4x8x1xf32, #tpu.memory_space<vmem>>, vector<1x8x1xf32>
      %31 = vector.shape_cast %30 : vector<1x8x1xf32> to vector<8x1xf32>
      %32 = tpu.reciprocal %31 {approx = true} : vector<8x1xf32> -> vector<8x1xf32>
      %c3_20 = arith.constant 3 : index
      %c0_21 = arith.constant 0 : index
      %c0_22 = arith.constant 0 : index
      %33 = vector.load %arg9[%c3_20, %c0_21, %c0_22] : memref<4x8x8xf32, #tpu.memory_space<vmem>>, vector<1x8x8xf32>
      %34 = vector.shape_cast %33 : vector<1x8x8xf32> to vector<8x8xf32>
      %35 = vector.broadcast %32 : vector<8x1xf32> to vector<8x8xf32>
      %36 = arith.mulf %34, %35 : vector<8x8xf32>
      %37 = tpu.concatenate %15, %22, %29, %36 in 1 : vector<8x8xf32>, vector<8x8xf32>, vector<8x8xf32>, vector<8x8xf32> -> vector<8x32xf32>
      %38 = arith.truncf %37 : vector<8x32xf32> to vector<8x32xbf16>
      %c0_23 = arith.constant 0 : index
      %c0_24 = arith.constant 0 : index
      %c0_25 = arith.constant 0 : index
      %39 = vector.load %arg6[%c0_23, %c0_24, %c0_25] : memref<1x8x32xbf16, #tpu.memory_space<vmem>>, vector<1x8x32xbf16>
      %40 = vector.shape_cast %39 : vector<1x8x32xbf16> to vector<8x32xbf16>
      %41 = vector.shape_cast %38 : vector<8x32xbf16> to vector<1x8x32xbf16>
      tpu.vector_store %arg6[%c0_23, %c0_24, %c0_25], %41 {strides = array<i32>} : memref<1x8x32xbf16, #tpu.memory_space<vmem>>, vector<1x8x32xbf16>,
    } else {
    }
    return
  }
  func.func @transform_0(%arg0: i32, %arg1: i32, %arg2: i32) -> (i32, i32, i32) {
    %c0_i32 = arith.constant 0 : i32
    %c0_i32_0 = arith.constant 0 : i32
    return %arg0, %arg1, %c0_i32 : i32, i32, i32
  }
  func.func @transform_1(%arg0: i32, %arg1: i32, %arg2: i32) -> (i32, i32, i32) {
    %0 = arith.minsi %arg2, %arg1 : i32
    %c0_i32 = arith.constant 0 : i32
    %c0_i32_0 = arith.constant 0 : i32
    return %arg0, %0, %c0_i32 : i32, i32, i32
  }
  func.func @transform_2(%arg0: i32, %arg1: i32, %arg2: i32) -> (i32, i32, i32) {
    %0 = arith.minsi %arg2, %arg1 : i32
    %c0_i32 = arith.constant 0 : i32
    %c0_i32_0 = arith.constant 0 : i32
    return %arg0, %0, %c0_i32 : i32, i32, i32
  }
  func.func @transform_3(%arg0: i32, %arg1: i32, %arg2: i32) -> (i32, i32, i32) {
    %c0_i32 = arith.constant 0 : i32
    %c0_i32_0 = arith.constant 0 : i32
    return %arg0, %arg1, %c0_i32 : i32, i32, i32
  }
}

module attributes {stable_mosaic.version = 11 : i64} {
  func.func @_fused_matmul_kernel(%arg0: i32, %arg1: i32, %arg2: i32, %arg3: memref<16x128xbf16, #tpu.memory_space<vmem>>, %arg4: memref<128x32xbf16, #tpu.memory_space<vmem>>, %arg5: memref<1x32xf32, #tpu.memory_space<vmem>>, %arg6: memref<16x32xbf16, #tpu.memory_space<vmem>>, %arg7: memref<16x32xbf16, #tpu.memory_space<vmem>>) attributes {dimension_semantics = [#tpu.dimension_semantics<parallel>, #tpu.dimension_semantics<parallel>, #tpu.dimension_semantics<arbitrary>], iteration_bounds = array<i64: 1, 1, 1>, scalar_prefetch = 0 : i64, scratch_operands = 0 : i64, tpu.core_type = #tpu.core_type<tc>, window_params = [{transform_indices = @transform_0, window_bounds = array<i64: 16, 128>}, {transform_indices = @transform_1, window_bounds = array<i64: 128, 32>}, {transform_indices = @transform_2, window_bounds = array<i64: 1, 32>}, {transform_indices = @transform_3, window_bounds = array<i64: 16, 32>}, {transform_indices = @transform_4, window_bounds = array<i64: 16, 32>}]} {
    %c0 = arith.constant 0 : index
    %c0_0 = arith.constant 0 : index
    %0 = vector.load %arg3[%c0, %c0_0] : memref<16x128xbf16, #tpu.memory_space<vmem>>, vector<16x128xbf16>
    %c0_1 = arith.constant 0 : index
    %c0_2 = arith.constant 0 : index
    %1 = vector.load %arg4[%c0_1, %c0_2] : memref<128x32xbf16, #tpu.memory_space<vmem>>, vector<128x32xbf16>
    %cst = arith.constant dense<0.000000e+00> : vector<16x32xf32>
    %2 = tpu.matmul %0, %1, %cst {dimension_numbers = #tpu.dot_dimension_numbers<[1], [0], [0], [1], [0, 0, 1, 1], [], []>} : vector<16x128xbf16>, vector<128x32xbf16>, vector<16x32xf32> -> vector<16x32xf32>
    %c0_3 = arith.constant 0 : index
    %c0_4 = arith.constant 0 : index
    %3 = vector.load %arg5[%c0_3, %c0_4] : memref<1x32xf32, #tpu.memory_space<vmem>>, vector<1x32xf32>
    %4 = vector.broadcast %3 : vector<1x32xf32> to vector<16x32xf32>
    %5 = arith.addf %2, %4 : vector<16x32xf32>
    %c0_5 = arith.constant 0 : index
    %c0_6 = arith.constant 0 : index
    %6 = vector.load %arg6[%c0_5, %c0_6] : memref<16x32xbf16, #tpu.memory_space<vmem>>, vector<16x32xbf16>
    %7 = arith.extf %6 : vector<16x32xbf16> to vector<16x32xf32>
    %8 = arith.addf %5, %7 : vector<16x32xf32>
    %9 = arith.truncf %8 : vector<16x32xf32> to vector<16x32xbf16>
    %c0_7 = arith.constant 0 : index
    %c0_8 = arith.constant 0 : index
    %10 = vector.load %arg7[%c0_7, %c0_8] : memref<16x32xbf16, #tpu.memory_space<vmem>>, vector<16x32xbf16>
    tpu.vector_store %arg7[%c0_7, %c0_8], %9 {strides = array<i32>} : memref<16x32xbf16, #tpu.memory_space<vmem>>, vector<16x32xbf16>,
    return
  }
  func.func @transform_0(%arg0: i32, %arg1: i32, %arg2: i32) -> (i32, i32) {
    %c0_i32 = arith.constant 0 : i32
    return %arg0, %arg2 : i32, i32
  }
  func.func @transform_1(%arg0: i32, %arg1: i32, %arg2: i32) -> (i32, i32) {
    %c0_i32 = arith.constant 0 : i32
    return %arg2, %arg1 : i32, i32
  }
  func.func @transform_2(%arg0: i32, %arg1: i32, %arg2: i32) -> (i32, i32) {
    %c0_i32 = arith.constant 0 : i32
    %c0_i32_0 = arith.constant 0 : i32
    return %c0_i32, %arg1 : i32, i32
  }
  func.func @transform_3(%arg0: i32, %arg1: i32, %arg2: i32) -> (i32, i32) {
    %c0_i32 = arith.constant 0 : i32
    return %arg0, %arg1 : i32, i32
  }
  func.func @transform_4(%arg0: i32, %arg1: i32, %arg2: i32) -> (i32, i32) {
    %c0_i32 = arith.constant 0 : i32
    return %arg0, %arg1 : i32, i32
  }
}

module attributes {stable_mosaic.version = 11 : i64} {
  func.func @_fused_matmul_kernel(%arg0: i32, %arg1: i32, %arg2: i32, %arg3: memref<16x32xbf16, #tpu.memory_space<vmem>>, %arg4: memref<32x32xbf16, #tpu.memory_space<vmem>>, %arg5: memref<1x32xf32, #tpu.memory_space<vmem>>, %arg6: memref<1x32xf32, #tpu.memory_space<vmem>>, %arg7: memref<1x32xf32, #tpu.memory_space<vmem>>, %arg8: memref<16x32xf32, #tpu.memory_space<vmem>>, %arg9: memref<16x32xbf16, #tpu.memory_space<vmem>>) attributes {dimension_semantics = [#tpu.dimension_semantics<parallel>, #tpu.dimension_semantics<arbitrary>, #tpu.dimension_semantics<arbitrary>], iteration_bounds = array<i64: 1, 1, 1>, scalar_prefetch = 0 : i64, scratch_operands = 1 : i64, tpu.core_type = #tpu.core_type<tc>, window_params = [{transform_indices = @transform_0, window_bounds = array<i64: 16, 32>}, {transform_indices = @transform_1, window_bounds = array<i64: 32, 32>}, {transform_indices = @transform_2, window_bounds = array<i64: 1, 32>}, {pipeline_mode = #tpu.pipeline_mode<synchronous>, transform_indices = @transform_3, window_bounds = array<i64: 1, 32>}, {pipeline_mode = #tpu.pipeline_mode<synchronous>, transform_indices = @transform_4, window_bounds = array<i64: 1, 32>}, {transform_indices = @transform_5, window_bounds = array<i64: 16, 32>}]} {
    %c0_i32 = arith.constant 0 : i32
    %0 = arith.cmpi eq, %arg1, %c0_i32 : i32
    %1 = arith.extui %0 : i1 to i32
    %c0_i32_0 = arith.constant 0 : i32
    %2 = arith.cmpi ne, %1, %c0_i32_0 : i32
    scf.if %2 {
      %c0_8 = arith.constant 0 : index
      %c0_9 = arith.constant 0 : index
      %10 = vector.load %arg3[%c0_8, %c0_9] : memref<16x32xbf16, #tpu.memory_space<vmem>>, vector<16x32xbf16>
      %11 = arith.extf %10 : vector<16x32xbf16> to vector<16x32xf32>
      %cst_10 = arith.constant dense<0.000000e+00> : vector<16xf32>
      %12 = vector.multi_reduction <add>, %11, %cst_10 [1] : vector<16x32xf32> to vector<16xf32>
      %13 = vector.shape_cast %12 : vector<16xf32> to vector<16x1xf32>
      %cst_11 = arith.constant 3.200000e+01 : f32
      %14 = vector.broadcast %cst_11 : f32 to vector<16x1xf32>
      %15 = arith.divf %13, %14 : vector<16x1xf32>
      %16 = vector.broadcast %15 : vector<16x1xf32> to vector<16x32xf32>
      %17 = arith.subf %11, %16 : vector<16x32xf32>
      %18 = arith.mulf %17, %17 : vector<16x32xf32>
      %cst_12 = arith.constant dense<0.000000e+00> : vector<16xf32>
      %19 = vector.multi_reduction <add>, %18, %cst_12 [1] : vector<16x32xf32> to vector<16xf32>
      %20 = vector.shape_cast %19 : vector<16xf32> to vector<16x1xf32>
      %cst_13 = arith.constant 3.200000e+01 : f32
      %21 = vector.broadcast %cst_13 : f32 to vector<16x1xf32>
      %22 = arith.divf %20, %21 : vector<16x1xf32>
      %23 = vector.broadcast %15 : vector<16x1xf32> to vector<16x32xf32>
      %24 = arith.subf %11, %23 : vector<16x32xf32>
      %cst_14 = arith.constant 9.99999974E-6 : f32
      %25 = vector.broadcast %cst_14 : f32 to vector<16x1xf32>
      %26 = arith.addf %22, %25 : vector<16x1xf32>
      %27 = math.rsqrt %26 : vector<16x1xf32>
      %28 = vector.broadcast %27 : vector<16x1xf32> to vector<16x32xf32>
      %29 = arith.mulf %24, %28 : vector<16x32xf32>
      %c0_15 = arith.constant 0 : index
      %c0_16 = arith.constant 0 : index
      %30 = vector.load %arg6[%c0_15, %c0_16] : memref<1x32xf32, #tpu.memory_space<vmem>>, vector<1x32xf32>
      %31 = vector.broadcast %30 : vector<1x32xf32> to vector<16x32xf32>
      %32 = arith.mulf %29, %31 : vector<16x32xf32>
      %c0_17 = arith.constant 0 : index
      %c0_18 = arith.constant 0 : index
      %33 = vector.load %arg7[%c0_17, %c0_18] : memref<1x32xf32, #tpu.memory_space<vmem>>, vector<1x32xf32>
      %34 = vector.broadcast %33 : vector<1x32xf32> to vector<16x32xf32>
      %35 = arith.addf %32, %34 : vector<16x32xf32>
      %36 = arith.truncf %35 : vector<16x32xf32> to vector<16x32xbf16>
      %c0_19 = arith.constant 0 : index
      %c0_20 = arith.constant 0 : index
      %37 = vector.load %arg9[%c0_19, %c0_20] : memref<16x32xbf16, #tpu.memory_space<vmem>>, vector<16x32xbf16>
      tpu.vector_store %arg9[%c0_19, %c0_20], %36 {strides = array<i32>} : memref<16x32xbf16, #tpu.memory_space<vmem>>, vector<16x32xbf16>,
    } else {
    }
    %c0 = arith.constant 0 : index
    %c0_1 = arith.constant 0 : index
    %3 = vector.load %arg9[%c0, %c0_1] : memref<16x32xbf16, #tpu.memory_space<vmem>>, vector<16x32xbf16>
    %c0_2 = arith.constant 0 : index
    %c0_3 = arith.constant 0 : index
    %4 = vector.load %arg4[%c0_2, %c0_3] : memref<32x32xbf16, #tpu.memory_space<vmem>>, vector<32x32xbf16>
    %cst = arith.constant dense<0.000000e+00> : vector<16x32xf32>
    %5 = tpu.matmul %3, %4, %cst {dimension_numbers = #tpu.dot_dimension_numbers<[1], [0], [0], [1], [0, 0, 1, 1], [], []>} : vector<16x32xbf16>, vector<32x32xbf16>, vector<16x32xf32> -> vector<16x32xf32>
    %c0_4 = arith.constant 0 : index
    %c0_5 = arith.constant 0 : index
    %6 = vector.load %arg5[%c0_4, %c0_5] : memref<1x32xf32, #tpu.memory_space<vmem>>, vector<1x32xf32>
    %7 = vector.broadcast %6 : vector<1x32xf32> to vector<16x32xf32>
    %8 = arith.addf %5, %7 : vector<16x32xf32>
    %c0_6 = arith.constant 0 : index
    %c0_7 = arith.constant 0 : index
    %9 = vector.load %arg8[%c0_6, %c0_7] : memref<16x32xf32, #tpu.memory_space<vmem>>, vector<16x32xf32>
    tpu.vector_store %arg8[%c0_6, %c0_7], %8 {strides = array<i32>} : memref<16x32xf32, #tpu.memory_space<vmem>>, vector<16x32xf32>,
    return
  }
  func.func @transform_0(%arg0: i32, %arg1: i32, %arg2: i32) -> (i32, i32) {
    %c0_i32 = arith.constant 0 : i32
    return %arg0, %arg2 : i32, i32
  }
  func.func @transform_1(%arg0: i32, %arg1: i32, %arg2: i32) -> (i32, i32) {
    %c0_i32 = arith.constant 0 : i32
    return %arg2, %arg1 : i32, i32
  }
  func.func @transform_2(%arg0: i32, %arg1: i32, %arg2: i32) -> (i32, i32) {
    %c0_i32 = arith.constant 0 : i32
    %c0_i32_0 = arith.constant 0 : i32
    return %c0_i32, %arg1 : i32, i32
  }
  func.func @transform_3(%arg0: i32, %arg1: i32, %arg2: i32) -> (i32, i32) {
    %c0_i32 = arith.constant 0 : i32
    %c0_i32_0 = arith.constant 0 : i32
    %c0_i32_1 = arith.constant 0 : i32
    return %c0_i32, %c0_i32_0 : i32, i32
  }
  func.func @transform_4(%arg0: i32, %arg1: i32, %arg2: i32) -> (i32, i32) {
    %c0_i32 = arith.constant 0 : i32
    %c0_i32_0 = arith.constant 0 : i32
    %c0_i32_1 = arith.constant 0 : i32
    return %c0_i32, %c0_i32_0 : i32, i32
  }
  func.func @transform_5(%arg0: i32, %arg1: i32, %arg2: i32) -> (i32, i32) {
    %c0_i32 = arith.constant 0 : i32
    return %arg0, %arg1 : i32, i32
  }
}

</mosaic_0001>

<bundles_post_ra>
// kernel: gpt_encoder_forward.11
= control target key start
LH: loop header
LB: loop body
LE: loop exit
PB: predicated region body
PF: predicated region fallthrough
CT: control target
= control target key end

     0   :  { %vm29_vm0 = vcmask 261120   ;;  %v215_v16 = vmov 0.0   ;;  %vm216_vm1 = vmmov 0   ;;  %vm83_vm2 = vcmask 257024   ;;  %s276_s0 = inlined_call_operand.vmem [shape: bf16[16,32], index: 0, kind: input, shape index: {}]   ;;  %s277_s1 = inlined_call_operand.vmem [shape: bf16[32,96], index: 1, kind: input, shape index: {}]   ;;  %s278_s3 = inlined_call_operand.vmem [shape: f32[1,32], index: 3, kind: input, shape index: {}]   ;;  %s279_s4 = inlined_call_operand.vmem [shape: f32[1,32], index: 4, kind: input, shape index: {}]   ;;  %s280_s2 = inlined_call_operand.vmem [shape: f32[1,96], index: 2, kind: input, shape index: {}]   ;;  %s281_s5 = inlined_call_operand.vmem [shape: bf16[16,96], index: 5, kind: output, shape index: {}]  }
   0x1   :  { %v192_v0 = vld [vmem:[%s276_s0] sm:$0xff]   ;;  %v208_v15 = vld [vmem:[%s277_s1 + $0x8] sm:$0xff]   ;;  %198 = vmatprep.subr.bf16.mxu0 %v215_v16  ;;  %202 = vmatprep.mubr.msk.bf16.mxu0 %vm216_vm1, %v215_v16  ;;  %vm169_vm3 = vcmask 781312  }
   0x2   :  { %v193_v1 = vunpack.c.l.bf16 %v192_v0  ;;  %v194_v2 = vunpack.c.h.bf16 %v192_v0  ;;  %199 = vmatpush3.bf16.msra.mxu0 %v208_v15  ;;  %v209_v17 = vld [vmem:[%s277_s1] sm:$0xff]  }
   0x3   :  { %200 = vmatprep.subr.bf16.mxu0 %v215_v16  ;;  %v176_v25 = vld [vmem:[%s278_s3] ss:$0 sm:$0xff] }
   0x4   :  { %v30_v3 = vsel %vm29_vm0, %v193_v1, 0.0  ;;  %v33_v4 = vsel %vm29_vm0, %v194_v2, 0.0  ;;  %v177_v27 = vld [vmem:[%s279_s4] ss:$0 sm:$0xff] }
   0x5   :  { %31 = vadd.xlane.f32.xlu0 %v30_v3  ;;  %v180_v37 = vld [vmem:[%s280_s2] ss:$0 sm:$0xff] }
   0x6   :  { %201 = vmatpush3.bf16.msra.mxu0 %v209_v17 }
   0x9   :  { %34 = vadd.xlane.f32.xlu0 %v33_v4 }
  0x8e   :  { %v32_v5 = vpop.xlane.xlu0 %31 }
  0x8f   :  { %v37_v6 = vmul.f32 0.03125, %v32_v5 }
  0x91   :  { %v39_v7 = vsub.f32 %v193_v1, %v37_v6 }
  0x92   :  { %v35_v8 = vpop.xlane.xlu0 %34 }
  0x93   :  { %v38_v9 = vmul.f32 0.03125, %v35_v8  ;;  %v41_v10 = vmul.f32 %v39_v7, %v39_v7 }
  0x95   :  { %v40_v11 = vsub.f32 %v194_v2, %v38_v9  ;;  %v43_v12 = vsel %vm29_vm0, %v41_v10, 0.0 }
  0x96   :  { %44 = vadd.xlane.f32.xlu1 %v43_v12 }
  0x97   :  { %v42_v13 = vmul.f32 %v40_v11, %v40_v11 }
  0x99   :  { %v46_v14 = vsel %vm29_vm0, %v42_v13, 0.0 }
  0x9a   :  { %47 = vadd.xlane.f32.xlu1 %v46_v14 }
 0x11f   :  { %v45_v18 = vpop.xlane.xlu1 %44 }
 0x120   :  { %v49_v19 = vmul.f32 0.03125, %v45_v18 }
 0x122   :  { %v51_v20 = vadd.f32 1e-05, %v49_v19 }
 0x123   :  { %v48_v21 = vpop.xlane.xlu1 %47 }
 0x124   :  { %211 = vrsqrt.f32 %v51_v20  ;;  %v50_v22 = vmul.f32 0.03125, %v48_v21 }
 0x126   :  { %v52_v23 = vadd.f32 1e-05, %v50_v22 }
 0x128   :  { %213 = vrsqrt.f32 %v52_v23 }
 0x131   :  { %v212_v24 = vpop.eup %211 }
 0x132   :  { %v55_v26 = vmul.f32 %v212_v24, %v39_v7 }
 0x134   :  { %v64_v28 = vmul.f32 %v176_v25, %v55_v26 }
 0x135   :  { %v214_v29 = vpop.eup %213 }
 0x136   :  { %v73_v30 = vadd.f32 %v177_v27, %v64_v28  ;;  %v56_v31 = vmul.f32 %v214_v29, %v40_v11 }
 0x138   :  { %v187_v32 = vpack.c.bf16 %v73_v30, %v73_v30  ;;  %v65_v33 = vmul.f32 %v176_v25, %v56_v31 }
 0x13a   :  { %84 = vst.msk [vmem:[#allocation2] sm:$0xf] %vm83_vm2, %v187_v32  ;;  %v74_v34 = vadd.f32 %v177_v27, %v65_v33 }
 0x13c   :  { %v188_v35 = vpack.c.bf16 %v74_v34, %v74_v34 }
 0x13e   :  { %85 = vst.msk [vmem:[#allocation2 + $0x4] sm:$0xf] %vm83_vm2, %v188_v35 }
 0x145   :  { %v210_v36 = vld [vmem:[#allocation2] sm:$0xff]  }
 0x146   :  { %203 = vmatmul.mubr.msk.bf16.vlgmr.msra.gmra.mxu0 %vm29_vm0, %v210_v36 }
 0x206   :  { %v154_v38 = vpop.f32.mrf.mxu0 }
 0x207   :  { %v155_v39 = vadd.f32 %v180_v37, %v154_v38 }
 0x208   :  { %v204_v40 = vpop.f32.mrf.mxu0 }
 0x209   :  { %v189_v41 = vpack.c.bf16 %v155_v39, %v155_v39 }
 0x20a   :  { %v157_v42 = vpop.f32.mrf.mxu0 }
 0x20b   :  { %170 = vst.msk [vmem:[%s281_s5] sm:$0xf] %vm169_vm3, %v189_v41  ;;  %v158_v43 = vadd.f32 %v180_v37, %v157_v42 }
 0x20c   :  { %v205_v44 = vpop.f32.mrf.mxu0 }
 0x20d   :  { %v190_v45 = vpack.c.bf16 %v158_v43, %v158_v43 }
 0x20f   :  { %171 = vst.msk [vmem:[%s281_s5 + $0x4] sm:$0xf] %vm169_vm3, %v190_v45 }

// kernel: gpt_encoder_forward.14
= control target key start
LH: loop header
LB: loop body
LE: loop exit
PB: predicated region body
PF: predicated region fallthrough
CT: control target
= control target key end

     0   :  { %vm29_vm0 = vcmask 261120   ;;  %v241_v16 = vmov 0.0   ;;  %vm242_vm1 = vmmov 0   ;;  %vm83_vm2 = vcmask 257024   ;;  %s299_s0 = inlined_call_operand.vmem [shape: bf16[16,32], index: 0, kind: input, shape index: {}]   ;;  %s300_s1 = inlined_call_operand.vmem [shape: bf16[32,128], index: 1, kind: input, shape index: {}]   ;;  %s301_s3 = inlined_call_operand.vmem [shape: f32[1,32], index: 3, kind: input, shape index: {}]   ;;  %s302_s4 = inlined_call_operand.vmem [shape: f32[1,32], index: 4, kind: input, shape index: {}]   ;;  %s303_s2 = inlined_call_operand.vmem [shape: f32[1,128], index: 2, kind: input, shape index: {}]   ;;  %s304_s5 = inlined_call_operand.vmem [shape: bf16[16,128], index: 5, kind: output, shape index: {}]  }
   0x1   :  { %v209_v0 = vld [vmem:[%s299_s0] sm:$0xff]   ;;  %v230_v15 = vld [vmem:[%s300_s1 + $0x8] sm:$0xff]   ;;  %220 = vmatprep.subr.bf16.mxu0 %v241_v16  ;;  %224 = vmatprep.mubr.msk.bf16.mxu0 %vm242_vm1, %v241_v16 }
   0x2   :  { %v210_v1 = vunpack.c.l.bf16 %v209_v0  ;;  %v211_v2 = vunpack.c.h.bf16 %v209_v0  ;;  %221 = vmatpush3.bf16.msra.mxu0 %v230_v15  ;;  %v231_v17 = vld [vmem:[%s300_s1] sm:$0xff]  }
   0x3   :  { %222 = vmatprep.subr.bf16.mxu0 %v241_v16  ;;  %v193_v25 = vld [vmem:[%s301_s3] ss:$0 sm:$0xff] }
   0x4   :  { %v30_v3 = vsel %vm29_vm0, %v210_v1, 0.0  ;;  %v33_v4 = vsel %vm29_vm0, %v211_v2, 0.0  ;;  %v194_v27 = vld [vmem:[%s302_s4] ss:$0 sm:$0xff] }
   0x5   :  { %31 = vadd.xlane.f32.xlu0 %v30_v3  ;;  %v197_v37 = vld [vmem:[%s303_s2] ss:$0 sm:$0xff] }
   0x6   :  { %223 = vmatpush3.bf16.msra.mxu0 %v231_v17 }
   0x9   :  { %34 = vadd.xlane.f32.xlu0 %v33_v4 }
  0x8e   :  { %v32_v5 = vpop.xlane.xlu0 %31 }
  0x8f   :  { %v37_v6 = vmul.f32 0.03125, %v32_v5 }
  0x91   :  { %v39_v7 = vsub.f32 %v210_v1, %v37_v6 }
  0x92   :  { %v35_v8 = vpop.xlane.xlu0 %34 }
  0x93   :  { %v38_v9 = vmul.f32 0.03125, %v35_v8  ;;  %v41_v10 = vmul.f32 %v39_v7, %v39_v7 }
  0x95   :  { %v40_v11 = vsub.f32 %v211_v2, %v38_v9  ;;  %v43_v12 = vsel %vm29_vm0, %v41_v10, 0.0 }
  0x96   :  { %44 = vadd.xlane.f32.xlu1 %v43_v12 }
  0x97   :  { %v42_v13 = vmul.f32 %v40_v11, %v40_v11 }
  0x99   :  { %v46_v14 = vsel %vm29_vm0, %v42_v13, 0.0 }
  0x9a   :  { %47 = vadd.xlane.f32.xlu1 %v46_v14 }
 0x11f   :  { %v45_v18 = vpop.xlane.xlu1 %44 }
 0x120   :  { %v49_v19 = vmul.f32 0.03125, %v45_v18 }
 0x122   :  { %v51_v20 = vadd.f32 1e-05, %v49_v19 }
 0x123   :  { %v48_v21 = vpop.xlane.xlu1 %47 }
 0x124   :  { %233 = vrsqrt.f32 %v51_v20  ;;  %v50_v22 = vmul.f32 0.03125, %v48_v21 }
 0x126   :  { %v52_v23 = vadd.f32 1e-05, %v50_v22 }
 0x128   :  { %235 = vrsqrt.f32 %v52_v23 }
 0x131   :  { %v234_v24 = vpop.eup %233 }
 0x132   :  { %v55_v26 = vmul.f32 %v234_v24, %v39_v7 }
 0x134   :  { %v64_v28 = vmul.f32 %v193_v25, %v55_v26 }
 0x135   :  { %v236_v29 = vpop.eup %235 }
 0x136   :  { %v73_v30 = vadd.f32 %v194_v27, %v64_v28  ;;  %v56_v31 = vmul.f32 %v236_v29, %v40_v11 }
 0x138   :  { %v204_v32 = vpack.c.bf16 %v73_v30, %v73_v30  ;;  %v65_v33 = vmul.f32 %v193_v25, %v56_v31 }
 0x13a   :  { %84 = vst.msk [vmem:[#allocation2] sm:$0xf] %vm83_vm2, %v204_v32  ;;  %v74_v34 = vadd.f32 %v194_v27, %v65_v33 }
 0x13c   :  { %v205_v35 = vpack.c.bf16 %v74_v34, %v74_v34 }
 0x13e   :  { %85 = vst.msk [vmem:[#allocation2 + $0x4] sm:$0xf] %vm83_vm2, %v205_v35 }
 0x145   :  { %v232_v36 = vld [vmem:[#allocation2] sm:$0xff]  }
 0x146   :  { %225 = vmatmul.mubr.msk.bf16.vlgmr.msra.gmra.mxu0 %vm29_vm0, %v232_v36 }
 0x206   :  { %v154_v38 = vpop.f32.mrf.mxu0 }
 0x207   :  { %v155_v39 = vadd.f32 %v197_v37, %v154_v38 }
 0x208   :  { %v226_v40 = vpop.f32.mrf.mxu0 }
 0x209   :  { %v163_v41 = vmul.f32 0.044715, %v155_v39  ;;  %v161_v57 = vmul.f32 0.5, %v155_v39 }
 0x20a   :  { %v157_v42 = vpop.f32.mrf.mxu0 }
 0x20b   :  { %v165_v43 = vmul.f32 %v163_v41, %v155_v39  ;;  %v158_v44 = vadd.f32 %v197_v37, %v157_v42 }
 0x20c   :  { %v227_v45 = vpop.f32.mrf.mxu0 }
 0x20d   :  { %v167_v46 = vmul.f32 %v165_v43, %v155_v39  ;;  %v164_v47 = vmul.f32 0.044715, %v158_v44  ;;  %v162_v58 = vmul.f32 0.5, %v158_v44 }
 0x20f   :  { %v169_v48 = vadd.f32 %v167_v46, %v155_v39  ;;  %v166_v49 = vmul.f32 %v164_v47, %v158_v44 }
 0x211   :  { %v171_v50 = vmul.f32 0.7978846, %v169_v48  ;;  %v168_v51 = vmul.f32 %v166_v49, %v158_v44 }
 0x213   :  { %237 = vtanh.f32 %v171_v50  ;;  %v170_v52 = vadd.f32 %v168_v51, %v158_v44 }
 0x215   :  { %v172_v53 = vmul.f32 0.7978846, %v170_v52 }
 0x217   :  { %239 = vtanh.f32 %v172_v53 }
 0x220   :  { %v238_v54 = vpop.eup %237 }
 0x221   :  { %v175_v55 = vadd.f32 1.0, %v238_v54 }
 0x223   :  { %v177_v60 = vmul.f32 %v175_v55, %v161_v57 }
 0x224   :  { %v240_v56 = vpop.eup %239 }
 0x225   :  { %v176_v59 = vadd.f32 1.0, %v240_v56 }
 0x227   :  { %v178_v61 = vmul.f32 %v176_v59, %v162_v58 }
 0x229   :  { %v215_v62 = vpack.c.bf16 %v178_v61, %v177_v60 }
 0x22b   :  { %216 = vst [vmem:[%s304_s5] sm:$0xff] %v215_v62  }

// kernel: gpt_encoder_forward.13
= control target key start
LH: loop header
LB: loop body
LE: loop exit
PB: predicated region body
PF: predicated region fallthrough
CT: control target
= control target key end

     0   :  { %v143_v0 = vmov 0.0   ;;  %vm144_vm0 = vmmov 0   ;;  %vm48_vm1 = vcmask 261120   ;;  %vm107_vm2 = vcmask 257024   ;;  %s191_s1 = inlined_call_operand.vmem [shape: bf16[32,32], index: 1, kind: input, shape index: {}]   ;;  %s192_s0 = inlined_call_operand.vmem [shape: bf16[16,32], index: 0, kind: input, shape index: {}]   ;;  %s193_s3 = inlined_call_operand.vmem [shape: bf16[16,32], index: 3, kind: input, shape index: {}]   ;;  %s194_s2 = inlined_call_operand.vmem [shape: f32[1,32], index: 2, kind: input, shape index: {}]   ;;  %s195_s4 = inlined_call_operand.vmem [shape: bf16[16,32], index: 4, kind: output, shape index: {}]  }
   0x1   :  { %130 = vmatprep.subr.bf16.mxu0 %v143_v0  ;;  %v140_v1 = vld [vmem:[%s191_s1 + $0x8] sm:$0xff]   ;;  %134 = vmatprep.mubr.msk.bf16.mxu0 %vm144_vm0, %v143_v0  ;;  %v141_v2 = vld [vmem:[%s191_s1] sm:$0xff]  }
   0x2   :  { %131 = vmatpush3.bf16.msra.mxu0 %v140_v1  ;;  %v142_v3 = vld [vmem:[%s192_s0] sm:$0xff]  }
   0x3   :  { %132 = vmatprep.subr.bf16.mxu0 %v143_v0  ;;  %v124_v4 = vld [vmem:[%s193_s3] sm:$0xff]  }
   0x4   :  { %v114_v5 = vld [vmem:[%s194_s2] ss:$0 sm:$0xff]  ;;  %v125_v6 = vunpack.c.l.bf16 %v124_v4  ;;  %v126_v11 = vunpack.c.h.bf16 %v124_v4 }
   0x6   :  { %133 = vmatpush3.bf16.msra.mxu0 %v141_v2 }
   0x9   :  { %135 = vmatmul.mubr.msk.bf16.vlgmr.msra.gmra.mxu0 %vm48_vm1, %v142_v3 }
  0xc9   :  { %v86_v7 = vpop.f32.mrf.mxu0 }
  0xca   :  { %v87_v8 = vadd.f32 %v114_v5, %v86_v7 }
  0xcb   :  { %v136_v9 = vpop.f32.mrf.mxu0 }
  0xcc   :  { %v97_v10 = vadd.f32 %v125_v6, %v87_v8 }
  0xcd   :  { %v89_v12 = vpop.f32.mrf.mxu0 }
  0xce   :  { %v121_v13 = vpack.c.bf16 %v97_v10, %v97_v10  ;;  %v90_v14 = vadd.f32 %v114_v5, %v89_v12 }
  0xcf   :  { %v137_v15 = vpop.f32.mrf.mxu0 }
  0xd0   :  { %108 = vst.msk [vmem:[%s195_s4] sm:$0xf] %vm107_vm2, %v121_v13  ;;  %v98_v16 = vadd.f32 %v126_v11, %v90_v14 }
  0xd2   :  { %v122_v17 = vpack.c.bf16 %v98_v16, %v98_v16 }
  0xd4   :  { %109 = vst.msk [vmem:[%s195_s4 + $0x4] sm:$0xf] %vm107_vm2, %v122_v17 }

// kernel: gpt_encoder_forward.12
= control target key start
LH: loop header
LB: loop body
LE: loop exit
PB: predicated region body
PF: predicated region fallthrough
CT: control target
= control target key end

     0   :  { %s1252_s12 = smov 0   ;;  %s1254_s13 = smov 0   ;;  %s1430_s0 = inlined_call_operand.vmem [shape: bf16[2,8,32], index: 0, kind: input, shape index: {}]   ;;  %s1431_s1 = inlined_call_operand.vmem [shape: bf16[2,8,32], index: 1, kind: input, shape index: {}]   ;;  %s1432_s2 = inlined_call_operand.vmem [shape: bf16[2,8,32], index: 2, kind: input, shape index: {}]   ;;  %s1433_s3 = inlined_call_operand.vmem [shape: bf16[2,8,32], index: 3, kind: output, shape index: {}]  }
   0x1   :  { %s1256_s14 = smov 0  }
   0x2 LB: > { %s32_s15 = sadd.s32 1, %s1216_s13  ;;  %p1054_p0 = scmp.ge.s32.totalorder %s1220_s14, 1  ;;  %s1220_s14 = sphi %s1256_s14, %s13_s14   ;;  %s1216_s13 = sphi %s1254_s13, %s1435_s13   ;;  %s1212_s12 = sphi %s1252_s12, %s1434_s12  }
   0x3   : > { %p34_p1 = scmp.ge.s32.totalorder %s32_s15, 2  ;;  %p206_p2 = scmp.lt.s32.totalorder %s1220_s14, 3 }
   0x5   : > { %s1437_s15 = smov (%p34_p1, %s32_s15), 0  ;;  %p207_p3 = pnand %p1054_p0, %p206_p2 }
   0x6   : > { %p252_p4 = scmp.lt.s32.totalorder (!%p207_p3), %s1212_s12, 1  ;;  %s1226_s23 = smov (!%p207_p3), 120  }
   0x7   : > { %210 = sbr.rel (%p207_p3) target bundleno = 1416 (0x588), region = 32  ;;  %s1227_s24 = smov (!%p207_p3), 112  }
   0x8   : > { %s1228_s25 = smov (!%p207_p3), 104   ;;  %s1229_s29 = smov (!%p207_p3), 8  }
   0x9   : > { %s1230_s30 = smov (!%p207_p3), 16   ;;  %s1231_s4 = smov (!%p207_p3), 24  }
   0xc   : > { %vm302_vm0 = vcmask 64512   ;;  %v1222_v0 = vmov 0.0   ;;  %vm1223_vm1 = vmmov 0   ;;  %s1439_s12 = smov (!%p252_p4, %s1212_s12), 1  ;;  %vm293_vm2 = vcmask 7168  }
   0xd   : > { %1088 = vmatprep.subr.bf16.mxu0 %v1222_v0  ;;  %303 = vst.msk [vmem:[#allocation4] sm:$0xff] %vm302_vm0, %v1222_v0  ;;  %304 = vst.msk [vmem:[#allocation4 + $0x8] sm:$0xff] %vm302_vm0, %v1222_v0  ;;  %1090 = vmatprep.mubr.msk.bf16.mxu0 %vm1223_vm1, %v1222_v0  ;;  %s1284_s16 = sshll.u32 %s1439_s12, 2  ;;  %v1224_v4 = vmov -1e+30   ;;  %v315_v5 = vlaneseq  ;;  %v1225_v15 = vmov 0  }
   0xe   : > { %305 = vst.msk [vmem:[#allocation4 + $0x10] sm:$0xff] %vm302_vm0, %v1222_v0  ;;  %306 = vst.msk [vmem:[#allocation4 + $0x18] sm:$0xff] %vm302_vm0, %v1222_v0  ;;  %1094 = vmatprep.subr.bf16.mxu1 %v1222_v0  ;;  %1096 = vmatprep.mubr.msk.bf16.mxu1 %vm1223_vm1, %v1222_v0  ;;  %s267_s19 = scalar_lea.vmem %s1431_s1, %s1284_s16  ;;  %s258_s22 = scalar_lea.vmem %s1430_s0, %s1284_s16  ;;  %vm409_vm4 = vcmask 1043456   ;;  %vm936_vm5 = vcmask 130048   ;;  %vm938_vm6 = vcmask 195584   ;;  %vm941_vm7 = vcmask 257024  }
   0xf   : > { %v312_v1 = vld [vmem:[%s267_s19] sm:$0xf]  ;;  %294 = vst.msk [vmem:[#allocation2] sm:$0xff] %vm293_vm2, %v1224_v4  ;;  %295 = vst.msk [vmem:[#allocation2 + $0x8] sm:$0xff] %vm293_vm2, %v1224_v4  ;;  %v1311_v6 = vshrl.u32 %v315_v5, 7  ;;  %v1313_v7 = vand.u32 127, %v315_v5  ;;  %1170 = vset.pattern.permute.xlu0 %v1225_v15  ;;  %1171 = vset.pattern.permute.xlu1 %v1225_v15  ;;  %s278_s28 = scalar_lea.vmem %s1432_s2, %s1284_s16  ;;  %s287_s7 = scalar_lea.vmem %s1433_s3, %s1284_s16 }
  0x10   : > { %v330_v2 = vsel %vm302_vm0, %v312_v1, 0  ;;  %v311_v3 = vld [vmem:[%s258_s22] sm:$0xf]  ;;  %296 = vst.msk [vmem:[#allocation2 + $0x10] sm:$0xff] %vm293_vm2, %v1224_v4  ;;  %297 = vst.msk [vmem:[#allocation2 + $0x18] sm:$0xff] %vm293_vm2, %v1224_v4  ;;  %v1062_v16 = vcombine.low %v312_v1, %v312_v1 }
  0x11   : > { %1089 = vmatpush3.bf16.xpose.msra.mxu0 %v330_v2  ;;  %298 = vst.msk [vmem:[#allocation3] sm:$0xff] %vm293_vm2, %v1222_v0  ;;  %299 = vst.msk [vmem:[#allocation3 + $0x8] sm:$0xff] %vm293_vm2, %v1222_v0  ;;  %vm324_vm3 = vcmp.ge.s32.totalorder %v1311_v6, %v1313_v7  ;;  %v1061_v17 = vcombine.low %v311_v3, %v311_v3  ;;  %v1341_v22 = vld [vmem:[%s278_s28] sm:$0xf] }
  0x12   : > { %1106 = vmatprep.subr.bf16.mxu0 %v1222_v0  ;;  %300 = vst.msk [vmem:[#allocation3 + $0x10] sm:$0xff] %vm293_vm2, %v1222_v0  ;;  %301 = vst.msk [vmem:[#allocation3 + $0x18] sm:$0xff] %vm293_vm2, %v1222_v0  ;;  %464 = vrot.lane.b32.xlu1 %v1062_v16, %s1226_s23  ;;  %v411_v23 = vsel %vm409_vm4, %v1341_v22, 0 }
  0x13   : > { %1095 = vmatpush3.bf16.msra.mxu1 %v411_v23 }
  0x14   : > { %1100 = vmatprep.subr.bf16.mxu1 %v1222_v0 }
  0x16   : > { %459 = vrot.lane.b32.xlu1 %v1061_v17, %s1226_s23  ;;  %v1327_v18 = vld [vmem:[#allocation2] sm:$0xff]  ;;  %v515_v63 = vld [vmem:[#allocation2 + $0x8] sm:$0xff] }
  0x17   : > { %v655_v4 = vld [vmem:[#allocation2 + $0x10] sm:$0xff]  ;;  %v792_v6 = vld [vmem:[#allocation2 + $0x18] sm:$0xff] }
  0x18   : > { %1091 = vmatmul.mubr.msk.bf16.vlgmr.msra.gmra.mxu0 %vm302_vm0, %v311_v3 }
  0x19   : > { %1108 = vmatprep.mubr.msk.bf16.mxu0 %vm1223_vm1, %v1222_v0 }
  0x1a   : > { %604 = vrot.lane.b32.xlu1 %v1062_v16, %s1227_s24 }
  0x1e   : > { %602 = vrot.lane.b32.xlu1 %v1061_v17, %s1227_s24 }
  0x22   : > { %741 = vrot.lane.b32.xlu1 %v1062_v16, %s1228_s25 }
  0x26   : > { %739 = vrot.lane.b32.xlu1 %v1061_v17, %s1228_s25 }
  0x84   : > { %v465_v27 = vpop.permute.xlu1 %464 }
  0x85   : > { %v470_v30 = vsel %vm302_vm0, %v465_v27, 0 }
  0x88   : > { %v460_v28 = vpop.permute.xlu1 %459 }
  0x8c   : > { %v605_v32 = vpop.permute.xlu1 %604 }
  0x8d   : > { %v610_v34 = vsel %vm302_vm0, %v605_v32, 0 }
  0x90   : > { %v603_v33 = vpop.permute.xlu1 %602 }
  0x94   : > { %v742_v35 = vpop.permute.xlu1 %741 }
  0x95   : > { %v747_v36 = vsel %vm302_vm0, %v742_v35, 0 }
  0x98   : > { %v740_v37 = vpop.permute.xlu1 %739 }
  0xd8   : > { %v366_v8 = vpop.f32.mrf.mxu0 }
  0xd9   : > { %v372_v9 = vmul.f32 0.35355338, %v366_v8 }
  0xda   : > { %v1092_v10 = vpop.f32.mrf.mxu0 }
  0xdb   : > { %v373_v11 = vsel %vm324_vm3, %v372_v9, -1e+30 }
  0xdc   : > { %v369_v12 = vpop.f32.mrf.mxu0  ;;  %v375_v13 = vsel %vm302_vm0, %v373_v11, -inf }
  0xdd   : > { %376 = vmax.xlane.f32.xlu0 %v375_v13 }
  0xde   : > { %v1093_v14 = vpop.f32.mrf.mxu0 }
 0x166   : > { %v377_v19 = vpop.xlane.xlu0 %376 }
 0x167   : > { %v1330_v20 = vmax.f32 %v1327_v18, %v377_v19 }
 0x169   : > { %v379_v21 = vsub.f32 %v1327_v18, %v1330_v20  ;;  %455 = vst.msk [vmem:[#allocation2] sm:$0xff] %vm293_vm2, %v1330_v20  ;;  %384 = vperm.xlu0 %1170, %v1330_v20  }
 0x1e4   : > { %v385_v24 = vpop.permute.xlu0 %384 }
 0x1e5   : > { %v387_v25 = vsub.f32 %v373_v11, %v385_v24  ;;  %v1064_v11 = vcombine.low %v1341_v22, %v1341_v22 }
 0x1e7   : > { %v388_v26 = vmul.f32 1.442695, %v387_v25 }
 0x1e9   : > { %1174 = vpow2.f32 %v388_v26 }
 0x1f6   : > { %v1346_v29 = vpop.eup %1174 }
 0x1f7   : > { %v405_v31 = vpack.c.bf16 %v1346_v29, %v1346_v29  ;;  %v392_v13 = vsel %vm302_vm0, %v1346_v29, 0.0 }
 0x1f9   : > { %1097 = vmatmul.mubr.msk.bf16.vlgmr.msra.gmra.mxu1 %vm302_vm0, %v405_v31 }
 0x1fa   : > { %1101 = vmatpush3.bf16.xpose.msra.mxu1 %v470_v30  ;;  %1102 = vmatprep.mubr.msk.bf16.mxu1 %vm1223_vm1, %v1222_v0 }
 0x1fb   : > { %1112 = vmatprep.subr.bf16.mxu1 %v1222_v0 }
 0x201   : > { %1103 = vmatmul.mubr.msk.bf16.vlgmr.msra.gmra.mxu1 %vm302_vm0, %v460_v28 }
 0x202   : > { %1113 = vmatpush3.bf16.xpose.msra.mxu1 %v610_v34  ;;  %1114 = vmatprep.mubr.msk.bf16.mxu1 %vm1223_vm1, %v1222_v0 }
 0x203   : > { %1124 = vmatprep.subr.bf16.mxu1 %v1222_v0 }
 0x209   : > { %1115 = vmatmul.mubr.msk.bf16.vlgmr.msra.gmra.mxu1 %vm302_vm0, %v603_v33 }
 0x20a   : > { %1125 = vmatpush3.bf16.xpose.msra.mxu1 %v747_v36  ;;  %1126 = vmatprep.mubr.msk.bf16.mxu1 %vm1223_vm1, %v1222_v0 }
 0x211   : > { %1127 = vmatmul.mubr.msk.bf16.vlgmr.msra.gmra.mxu1 %vm302_vm0, %v740_v37 }
 0x2b9   : > { %v1365_v38 = vpop.f32.mrf.mxu1 }
 0x2bb   : > { %v1098_v39 = vpop.f32.mrf.mxu1 }
 0x2bc   : > { %v380_v39 = vmul.f32 1.442695, %v379_v21 }
 0x2bd   : > { %v450_v40 = vpop.f32.mrf.mxu1 }
 0x2bf   : > { %v1099_v41 = vpop.f32.mrf.mxu1 }
 0x2c1   : > { %v506_v42 = vpop.f32.mrf.mxu1 }
 0x2c2   : > { %v512_v43 = vmul.f32 0.35355338, %v506_v42 }
 0x2c3   : > { %v1104_v44 = vpop.f32.mrf.mxu1 }
 0x2c4   : > { %v513_v45 = vsel %vm324_vm3, %v512_v43, -1e+30 }
 0x2c5   : > { %v509_v46 = vpop.f32.mrf.mxu1  ;;  %v516_v47 = vsel %vm302_vm0, %v513_v45, -inf }
 0x2c6   : > { %517 = vmax.xlane.f32.xlu1 %v516_v47  ;;  %v390_v46 = vld [vmem:[#allocation3] sm:$0xff] }
 0x2c7   : > { %v1105_v48 = vpop.f32.mrf.mxu1 }
 0x2c9   : > { %v646_v49 = vpop.f32.mrf.mxu1 }
 0x2ca   : > { %v652_v50 = vmul.f32 0.35355338, %v646_v49 }
 0x2cb   : > { %v1116_v51 = vpop.f32.mrf.mxu1 }
 0x2cc   : > { %v653_v52 = vsel %vm324_vm3, %v652_v50, -1e+30 }
 0x2cd   : > { %v649_v53 = vpop.f32.mrf.mxu1  ;;  %v656_v54 = vsel %vm302_vm0, %v653_v52, -inf }
 0x2ce   : > { %657 = vmax.xlane.f32.xlu0 %v656_v54 }
 0x2cf   : > { %v1117_v55 = vpop.f32.mrf.mxu1 }
 0x2d1   : > { %v783_v56 = vpop.f32.mrf.mxu1 }
 0x2d2   : > { %v789_v57 = vmul.f32 0.35355338, %v783_v56  ;;  %v672_v56 = vld [vmem:[#allocation3 + $0x10] sm:$0xff] }
 0x2d3   : > { %v1128_v58 = vpop.f32.mrf.mxu1 }
 0x2d4   : > { %v790_v59 = vsel %vm324_vm3, %v789_v57, -1e+30 }
 0x2d5   : > { %v786_v60 = vpop.f32.mrf.mxu1  ;;  %v793_v61 = vsel %vm302_vm0, %v790_v59, -inf }
 0x2d6   : > { %794 = vmax.xlane.f32.xlu1 %v793_v61  ;;  %v809_v61 = vld [vmem:[#allocation3 + $0x18] sm:$0xff] }
 0x2d7   : > { %v1129_v62 = vpop.f32.mrf.mxu1 }
 0x2d8   : > { %v398_v62 = vld [vmem:[#allocation4] sm:$0xff] }
 0x34f   : > { %v518_v1 = vpop.xlane.xlu1 %517 }
 0x350   : > { %v519_v2 = vmax.f32 %v515_v63, %v518_v1 }
 0x352   : > { %v520_v3 = vsub.f32 %v515_v63, %v519_v2  ;;  %601 = vst.msk [vmem:[#allocation2 + $0x8] sm:$0xff] %vm293_vm2, %v519_v2  ;;  %525 = vperm.xlu1 %1171, %v519_v2  }
 0x354   : > { %v521_v41 = vmul.f32 1.442695, %v520_v3 }
 0x357   : > { %v658_v5 = vpop.xlane.xlu0 %657 }
 0x358   : > { %v659_v8 = vmax.f32 %v655_v4, %v658_v5 }
 0x35a   : > { %v660_v9 = vsub.f32 %v655_v4, %v659_v8  ;;  %738 = vst.msk [vmem:[#allocation2 + $0x10] sm:$0xff] %vm293_vm2, %v659_v8  ;;  %665 = vperm.xlu0 %1170, %v659_v8  }
 0x35c   : > { %v661_v44 = vmul.f32 1.442695, %v660_v9 }
 0x35f   : > { %v795_v7 = vpop.xlane.xlu1 %794 }
 0x360   : > { %v796_v10 = vmax.f32 %v792_v6, %v795_v7 }
 0x362   : > { %v797_v12 = vsub.f32 %v792_v6, %v796_v10  ;;  %875 = vst.msk [vmem:[#allocation2 + $0x18] sm:$0xff] %vm293_vm2, %v796_v10  ;;  %802 = vperm.xlu1 %1171, %v796_v10  }
 0x364   : > { %v798_v43 = vmul.f32 1.442695, %v797_v12 }
 0x366   : > { %551 = vrot.lane.b32.xlu1 %v1064_v11, %s1226_s23 }
 0x36a   : > { %688 = vrot.lane.b32.xlu1 %v1064_v11, %s1227_s24 }
 0x36e   : > { %825 = vrot.lane.b32.xlu1 %v1064_v11, %s1228_s25  ;;  %v540_v11 = vld [vmem:[#allocation4 + $0x8] sm:$0xff] }
 0x392   : > { %393 = vadd.xlane.f32.xlu1 %v392_v13 }
 0x3cd   : > { %v526_v14 = vpop.permute.xlu1 %525 }
 0x3ce   : > { %v528_v15 = vsub.f32 %v513_v45, %v526_v14 }
 0x3d0   : > { %v529_v16 = vmul.f32 1.442695, %v528_v15 }
 0x3d2   : > { %1176 = vpow2.f32 %v529_v16 }
 0x3d5   : > { %v666_v17 = vpop.permute.xlu0 %665 }
 0x3d6   : > { %v668_v19 = vsub.f32 %v653_v52, %v666_v17  ;;  %v532_v52 = vld [vmem:[#allocation3 + $0x8] sm:$0xff] }
 0x3d8   : > { %v669_v22 = vmul.f32 1.442695, %v668_v19 }
 0x3da   : > { %1178 = vpow2.f32 %v669_v22 }
 0x3dd   : > { %v803_v23 = vpop.permute.xlu1 %802 }
 0x3de   : > { %v805_v24 = vsub.f32 %v790_v59, %v803_v23 }
 0x3df   : > { %v1177_v25 = vpop.eup %1176 }
 0x3e0   : > { %v806_v26 = vmul.f32 1.442695, %v805_v24  ;;  %v534_v27 = vsel %vm302_vm0, %v1177_v25, 0.0  ;;  %v547_v30 = vpack.c.bf16 %v1177_v25, %v1177_v25 }
 0x3e1   : > { %535 = vadd.xlane.f32.xlu0 %v534_v27  ;;  %v552_v28 = vpop.permute.xlu1 %551  ;;  %v817_v27 = vld [vmem:[#allocation4 + $0x18] sm:$0xff] }
 0x3e2   : > { %1180 = vpow2.f32 %v806_v26  ;;  %v557_v29 = vsel %vm409_vm4, %v552_v28, 0 }
 0x3e3   : > { %1107 = vmatpush3.bf16.msra.mxu0 %v557_v29  ;;  %1182 = vpow2.f32 %v380_v39 }
 0x3e4   : > { %1118 = vmatprep.subr.bf16.mxu0 %v1222_v0  ;;  %1184 = vpow2.f32 %v521_v41 }
 0x3e5   : > { %v689_v31 = vpop.permute.xlu1 %688  ;;  %1186 = vpow2.f32 %v798_v43 }
 0x3e6   : > { %1109 = vmatmul.mubr.msk.bf16.vlgmr.msra.gmra.mxu0 %vm302_vm0, %v547_v30  ;;  %v694_v32 = vsel %vm409_vm4, %v689_v31, 0  ;;  %1188 = vpow2.f32 %v661_v44 }
 0x3e7   : > { %v1179_v33 = vpop.eup %1178  ;;  %1119 = vmatpush3.bf16.msra.mxu0 %v694_v32  ;;  %1120 = vmatprep.mubr.msk.bf16.mxu0 %vm1223_vm1, %v1222_v0 }
 0x3e8   : > { %v674_v34 = vsel %vm302_vm0, %v1179_v33, 0.0  ;;  %1130 = vmatprep.subr.bf16.mxu0 %v1222_v0  ;;  %v687_v36 = vpack.c.bf16 %v1179_v33, %v1179_v33 }
 0x3e9   : > { %675 = vadd.xlane.f32.xlu0 %v674_v34  ;;  %v826_v35 = vpop.permute.xlu1 %825 }
 0x3ea   : > { %v831_v37 = vsel %vm409_vm4, %v826_v35, 0 }
 0x3ee   : > { %1121 = vmatmul.mubr.msk.bf16.vlgmr.msra.gmra.mxu0 %vm302_vm0, %v687_v36 }
 0x3ef   : > { %v1181_v40 = vpop.eup %1180  ;;  %1131 = vmatpush3.bf16.msra.mxu0 %v831_v37  ;;  %1132 = vmatprep.mubr.msk.bf16.mxu0 %vm1223_vm1, %v1222_v0 }
 0x3f0   : > { %v811_v42 = vsel %vm302_vm0, %v1181_v40, 0.0  ;;  %v824_v45 = vpack.c.bf16 %v1181_v40, %v1181_v40  ;;  %v1183_v18 = vpop.eup %1182 }
 0x3f1   : > { %812 = vadd.xlane.f32.xlu1 %v811_v42  ;;  %v1185_v20 = vpop.eup %1184  ;;  %v391_v47 = vmul.f32 %v1183_v18, %v390_v46 }
 0x3f2   : > { %v1187_v21 = vpop.eup %1186  ;;  %v533_v53 = vmul.f32 %v1185_v20, %v532_v52 }
 0x3f3   : > { %v1189_v0 = vpop.eup %1188  ;;  %v810_v63 = vmul.f32 %v1187_v21, %v809_v61 }
 0x3f4   : > { %v673_v57 = vmul.f32 %v1189_v0, %v672_v56 }
 0x3f6   : > { %1133 = vmatmul.mubr.msk.bf16.vlgmr.msra.gmra.mxu0 %vm302_vm0, %v824_v45 }
 0x3ff   : > { %401 = vperm.xlu0 %1170, %v1183_v18  }
 0x402   : > { %543 = vperm.xlu1 %1171, %v1185_v20  }
 0x403   : > { %820 = vperm.xlu0 %1170, %v1187_v21  }
 0x406   : > { %683 = vperm.xlu1 %1171, %v1189_v0  }
 0x41b   : > { %v394_v48 = vpop.xlane.xlu1 %393 }
 0x41c   : > { %v395_v49 = vadd.f32 %v394_v48, %v391_v47 }
 0x41e   : > { %397 = vst.msk [vmem:[#allocation3] sm:$0xff] %vm293_vm2, %v395_v49 }
 0x425   : > { %v880_v50 = vld [vmem:[#allocation3] sm:$0xff] }
 0x426   : > { %1190 = vrcp.f32 %v880_v50 }
 0x433   : > { %v1191_v51 = vpop.eup %1190 }
 0x434   : > { %885 = vperm.xlu1 %1171, %v1191_v51  }
 0x46a   : > { %v536_v54 = vpop.xlane.xlu0 %535 }
 0x46b   : > { %v537_v55 = vadd.f32 %v536_v54, %v533_v53 }
 0x46d   : > { %538 = vst.msk [vmem:[#allocation3 + $0x8] sm:$0xff] %vm293_vm2, %v537_v55 }
 0x472   : > { %v676_v58 = vpop.xlane.xlu0 %675 }
 0x473   : > { %v677_v59 = vadd.f32 %v676_v58, %v673_v57 }
 0x474   : > { %v890_v60 = vld [vmem:[#allocation3 + $0x8] sm:$0xff] }
 0x475   : > { %678 = vst.msk [vmem:[#allocation3 + $0x10] sm:$0xff] %vm293_vm2, %v677_v59  ;;  %1192 = vrcp.f32 %v890_v60 }
 0x47a   : > { %v813_v1 = vpop.xlane.xlu1 %812  ;;  %v402_v2 = vpop.permute.xlu0 %401 }
 0x47b   : > { %v814_v3 = vadd.f32 %v813_v1, %v810_v63  ;;  %v404_v4 = vmul.f32 %v402_v2, %v398_v62 }
 0x47c   : > { %v901_v5 = vld [vmem:[#allocation3 + $0x10] sm:$0xff] }
 0x47d   : > { %815 = vst.msk [vmem:[#allocation3 + $0x18] sm:$0xff] %vm293_vm2, %v814_v3  ;;  %v453_v8 = vadd.f32 %v1365_v38, %v404_v4  ;;  %1194 = vrcp.f32 %v901_v5  ;;  %v680_v38 = vld [vmem:[#allocation4 + $0x10] sm:$0xff] }
 0x47e   : > { %v544_v12 = vpop.permute.xlu1 %543  ;;  %v821_v28 = vpop.permute.xlu0 %820 }
 0x47f   : > { %454 = vst.msk [vmem:[#allocation4] sm:$0xff] %vm302_vm0, %v453_v8  ;;  %v546_v13 = vmul.f32 %v544_v12, %v540_v11  ;;  %v823_v31 = vmul.f32 %v821_v28, %v817_v27 }
 0x482   : > { %v1193_v9 = vpop.eup %1192  ;;  %v684_v17 = vpop.permute.xlu1 %683 }
 0x483   : > { %896 = vperm.xlu0 %1170, %v1193_v9   ;;  %v686_v23 = vmul.f32 %v684_v17, %v680_v38 }
 0x484   : > { %v912_v6 = vld [vmem:[#allocation3 + $0x18] sm:$0xff] }
 0x485   : > { %1196 = vrcp.f32 %v912_v6 }
 0x486   : > { %v882_v21 = vld [vmem:[#allocation4] sm:$0xff] }
 0x48a   : > { %v1195_v7 = vpop.eup %1194 }
 0x48b   : > { %907 = vperm.xlu1 %1171, %v1195_v7  }
 0x492   : > { %v1197_v10 = vpop.eup %1196 }
 0x493   : > { %918 = vperm.xlu0 %1170, %v1197_v10  }
 0x4a6   : > { %v593_v14 = vpop.f32.mrf.mxu0 }
 0x4a7   : > { %v599_v15 = vadd.f32 %v593_v14, %v546_v13 }
 0x4a8   : > { %v1110_v16 = vpop.f32.mrf.mxu0 }
 0x4a9   : > { %600 = vst.msk [vmem:[#allocation4 + $0x8] sm:$0xff] %vm302_vm0, %v599_v15 }
 0x4aa   : > { %v596_v19 = vpop.f32.mrf.mxu0 }
 0x4ac   : > { %v1111_v22 = vpop.f32.mrf.mxu0 }
 0x4ae   : > { %v730_v24 = vpop.f32.mrf.mxu0 }
 0x4af   : > { %v736_v25 = vadd.f32 %v730_v24, %v686_v23  ;;  %v886_v41 = vpop.permute.xlu1 %885 }
 0x4b0   : > { %v1122_v26 = vpop.f32.mrf.mxu0  ;;  %v893_v39 = vld [vmem:[#allocation4 + $0x8] sm:$0xff]  ;;  %v888_v46 = vmul.f32 %v886_v41, %v882_v21 }
 0x4b1   : > { %737 = vst.msk [vmem:[#allocation4 + $0x10] sm:$0xff] %vm302_vm0, %v736_v25 }
 0x4b2   : > { %v733_v29 = vpop.f32.mrf.mxu0 }
 0x4b4   : > { %v1123_v30 = vpop.f32.mrf.mxu0 }
 0x4b6   : > { %v867_v32 = vpop.f32.mrf.mxu0 }
 0x4b7   : > { %v873_v33 = vadd.f32 %v867_v32, %v823_v31 }
 0x4b8   : > { %v1134_v34 = vpop.f32.mrf.mxu0  ;;  %v904_v43 = vld [vmem:[#allocation4 + $0x10] sm:$0xff] }
 0x4b9   : > { %874 = vst.msk [vmem:[#allocation4 + $0x18] sm:$0xff] %vm302_vm0, %v873_v33 }
 0x4ba   : > { %v870_v35 = vpop.f32.mrf.mxu0 }
 0x4bc   : > { %v1135_v36 = vpop.f32.mrf.mxu0 }
 0x4c0   : > { %v915_v18 = vld [vmem:[#allocation4 + $0x18] sm:$0xff] }
 0x4fe   : > { %v897_v37 = vpop.permute.xlu0 %896 }
 0x4ff   : > { %v899_v40 = vmul.f32 %v897_v37, %v893_v39 }
 0x501   : > { %923 = vrot.lane.b32.xlu1 %v899_v40, %s1229_s29 }
 0x506   : > { %v908_v42 = vpop.permute.xlu1 %907 }
 0x507   : > { %v910_v44 = vmul.f32 %v908_v42, %v904_v43 }
 0x509   : > { %927 = vrot.lane.b32.xlu0 %v910_v44, %s1230_s30 }
 0x50e   : > { %v919_v45 = vpop.permute.xlu0 %918 }
 0x50f   : > { %v921_v20 = vmul.f32 %v919_v45, %v915_v18 }
 0x511   : > { %931 = vrot.lane.b32.xlu1 %v921_v20, %s1231_s4 }
 0x573   : > { %v924_v0 = vpop.permute.xlu1 %923 }
 0x574   : > { %v935_v48 = vsel %vm302_vm0, %v888_v46, %v924_v0 }
 0x57b   : > { %v928_v47 = vpop.permute.xlu0 %927 }
 0x57c   : > { %v937_v49 = vsel %vm936_vm5, %v935_v48, %v928_v47 }
 0x583   : > { %v932_v50 = vpop.permute.xlu1 %931 }
 0x584   : > { %v939_v51 = vsel %vm938_vm6, %v937_v49, %v932_v50 }
 0x585   : > { %v940_v52 = vpack.c.bf16 %v939_v51, %v939_v51 }
 0x587   : > { %942 = vst.msk [vmem:[%s287_s7] sm:$0xf] %vm941_vm7, %v940_v52 }
 0x588 PF: > { %s13_s14 = sadd.s32 1, %s1220_s14   ;;  %s1434_s12 = smov %s1216_s13 }
 0x589   : > { %p10_p5 = scmp.ge.s32.totalorder %s13_s14, 4   ;;  %s1435_s13 = smov %s1437_s15 }
 0x58b   :  { %12 = sbr.rel (!%p10_p5) target bundleno = 2 (0x2), region = 95 }

// kernel: gpt_encoder_forward.15
= control target key start
LH: loop header
LB: loop body
LE: loop exit
PB: predicated region body
PF: predicated region fallthrough
CT: control target
= control target key end

     0   :  { %v217_v0 = vmov 0.0   ;;  %vm218_vm0 = vmmov 0   ;;  %vm152_vm1 = vcmask 257024   ;;  %s283_s1 = inlined_call_operand.vmem [shape: bf16[128,32], index: 1, kind: input, shape index: {}]   ;;  %s284_s0 = inlined_call_operand.vmem [shape: bf16[16,128], index: 0, kind: input, shape index: {}]   ;;  %s285_s3 = inlined_call_operand.vmem [shape: bf16[16,32], index: 3, kind: input, shape index: {}]   ;;  %s286_s2 = inlined_call_operand.vmem [shape: f32[1,32], index: 2, kind: input, shape index: {}]   ;;  %s287_s4 = inlined_call_operand.vmem [shape: bf16[16,32], index: 4, kind: output, shape index: {}]  }
   0x1   :  { %186 = vmatprep.subr.bf16.mxu0 %v217_v0  ;;  %v208_v1 = vld [vmem:[%s283_s1 + $0x38] sm:$0xff]   ;;  %202 = vmatprep.mubr.msk.bf16.mxu0 %vm218_vm0, %v217_v0  ;;  %v209_v2 = vld [vmem:[%s283_s1 + $0x30] sm:$0xff]   ;;  %v210_v3 = vld [vmem:[%s283_s1 + $0x28] sm:$0xff]  }
   0x2   :  { %187 = vmatpush3.bf16.msra.mxu0 %v208_v1  ;;  %v211_v4 = vld [vmem:[%s283_s1 + $0x20] sm:$0xff]   ;;  %v212_v5 = vld [vmem:[%s283_s1 + $0x18] sm:$0xff]   ;;  %v213_v6 = vld [vmem:[%s283_s1 + $0x10] sm:$0xff]  }
   0x3   :  { %188 = vmatprep.subr.bf16.mxu0 %v217_v0  ;;  %v214_v7 = vld [vmem:[%s283_s1 + $0x8] sm:$0xff]   ;;  %v215_v8 = vld [vmem:[%s283_s1] sm:$0xff]  }
   0x4   :  { %v216_v9 = vld [vmem:[%s284_s0] sm:$0xff]  }
   0x5   :  { %v174_v10 = vld [vmem:[%s285_s3] sm:$0xff]  }
   0x6   :  { %189 = vmatpush3.bf16.msra.mxu0 %v209_v2  ;;  %v159_v11 = vld [vmem:[%s286_s2] ss:$0 sm:$0xff]  ;;  %v175_v12 = vunpack.c.l.bf16 %v174_v10  ;;  %v176_v17 = vunpack.c.h.bf16 %v174_v10 }
   0x7   :  { %190 = vmatprep.subr.bf16.mxu0 %v217_v0 }
   0xa   :  { %191 = vmatpush3.bf16.msra.mxu0 %v210_v3 }
   0xb   :  { %192 = vmatprep.subr.bf16.mxu0 %v217_v0 }
   0xe   :  { %193 = vmatpush3.bf16.msra.mxu0 %v211_v4 }
   0xf   :  { %194 = vmatprep.subr.bf16.mxu0 %v217_v0 }
  0x12   :  { %195 = vmatpush3.bf16.msra.mxu0 %v212_v5 }
  0x13   :  { %196 = vmatprep.subr.bf16.mxu0 %v217_v0 }
  0x16   :  { %197 = vmatpush3.bf16.msra.mxu0 %v213_v6 }
  0x17   :  { %198 = vmatprep.subr.bf16.mxu0 %v217_v0 }
  0x1a   :  { %199 = vmatpush3.bf16.msra.mxu0 %v214_v7 }
  0x1b   :  { %200 = vmatprep.subr.bf16.mxu0 %v217_v0 }
  0x1e   :  { %201 = vmatpush3.bf16.msra.mxu0 %v215_v8 }
  0x21   :  { %203 = vmatmul.mubr.bf16.vlgmr.msra.gmra.mxu0 %v216_v9 }
  0xe1   :  { %v131_v13 = vpop.f32.mrf.mxu0 }
  0xe2   :  { %v132_v14 = vadd.f32 %v159_v11, %v131_v13 }
  0xe3   :  { %v204_v15 = vpop.f32.mrf.mxu0 }
  0xe4   :  { %v142_v16 = vadd.f32 %v175_v12, %v132_v14 }
  0xe5   :  { %v134_v18 = vpop.f32.mrf.mxu0 }
  0xe6   :  { %v171_v19 = vpack.c.bf16 %v142_v16, %v142_v16  ;;  %v135_v20 = vadd.f32 %v159_v11, %v134_v18 }
  0xe7   :  { %v205_v21 = vpop.f32.mrf.mxu0 }
  0xe8   :  { %153 = vst.msk [vmem:[%s287_s4] sm:$0xf] %vm152_vm1, %v171_v19  ;;  %v143_v22 = vadd.f32 %v176_v17, %v135_v20 }
  0xea   :  { %v172_v23 = vpack.c.bf16 %v143_v22, %v143_v22 }
  0xec   :  { %154 = vst.msk [vmem:[%s287_s4 + $0x4] sm:$0xf] %vm152_vm1, %v172_v23 }

// kernel: gpt_encoder_forward.21
= control target key start
LH: loop header
LB: loop body
LE: loop exit
PB: predicated region body
PF: predicated region fallthrough
CT: control target
= control target key end

     0   :  { %vm30_vm0 = vcmask 261120   ;;  %s303_s0 = inlined_call_operand.vmem [shape: bf16[16,32], index: 0, kind: input, shape index: {}]   ;;  %s304_s1 = inlined_call_operand.vmem [shape: bf16[32,32], index: 1, kind: input, shape index: {}]   ;;  %s305_s2 = inlined_call_operand.vmem [shape: f32[1,32], index: 2, kind: input, shape index: {}]   ;;  %s306_s3 = inlined_call_operand.vmem [shape: f32[1,32], index: 3, kind: input, shape index: {}]   ;;  %s307_s4 = inlined_call_operand.vmem [shape: f32[1,32], index: 4, kind: input, shape index: {}]   ;;  %s308_s5 = inlined_call_operand.hbm [shape: f32[16,32], index: 5, kind: output, shape index: {}]  }
   0x1   :  { %v192_v0 = vld [vmem:[%s303_s0] sm:$0xff]  }
   0x2   :  { %v193_v1 = vunpack.c.l.bf16 %v192_v0  ;;  %v194_v2 = vunpack.c.h.bf16 %v192_v0 }
   0x3   :  { %10 = vsyncpa [#allocation4], 0  ;;  %v211_v15 = vld [vmem:[%s304_s1 + $0x8] sm:$0xff]   ;;  %v240_v16 = vmov 0.0   ;;  %vm241_vm1 = vmmov 0   ;;  %v212_v17 = vld [vmem:[%s304_s1] sm:$0xff]  }
   0x4   :  { %v31_v3 = vsel %vm30_vm0, %v193_v1, 0.0  ;;  %v34_v4 = vsel %vm30_vm0, %v194_v2, 0.0  ;;  %198 = vmatprep.subr.bf16.mxu0 %v240_v16  ;;  %202 = vmatprep.mubr.msk.bf16.mxu0 %vm241_vm1, %v240_v16  ;;  %v180_v25 = vld [vmem:[%s306_s3] ss:$0 sm:$0xff]  ;;  %vm84_vm2 = vcmask 257024  }
   0x5   :  { %32 = vadd.xlane.f32.xlu0 %v31_v3  ;;  %199 = vmatpush3.bf16.msra.mxu0 %v211_v15  ;;  %v181_v27 = vld [vmem:[%s307_s4] ss:$0 sm:$0xff]  ;;  %s242_s4 = smov [#allocation3]  }
   0x6   :  { %200 = vmatprep.subr.bf16.mxu0 %v240_v16  ;;  %v184_v37 = vld [vmem:[%s305_s2] ss:$0 sm:$0xff]  ;;  %s169_s27 = sshll.u32 %s242_s4, 4  ;;  %s170_s27 = int_to_ptr.vmem [resolvable:$true] %s169_s27 }
   0x7   :  { %s218_s28 = scalar_lea.vmem %s170_s27, 256  ;;  %p223_p1 = scmp.lt.s32.totalorder %s170_s27, %s170_s27 }
   0x8   :  { %p219_p0 = scmp.ne.s32.totalorder %s170_s27, %s218_s28  ;;  %p224_p2 = scmp.lt.s32.totalorder %s218_s28, %s218_s28 }
   0x9   :  { %35 = vadd.xlane.f32.xlu0 %v34_v4  ;;  %201 = vmatpush3.bf16.msra.mxu0 %v212_v17 }
   0xa   :  { %p225_p3 = por %p224_p2, %p223_p1 }
   0xc   :  { %p226_p4 = pnand %p225_p3, %p219_p0 }
  0x8e   :  { %v33_v5 = vpop.xlane.xlu0 %32 }
  0x8f   :  { %v38_v6 = vmul.f32 0.03125, %v33_v5 }
  0x91   :  { %v40_v7 = vsub.f32 %v193_v1, %v38_v6 }
  0x92   :  { %v36_v8 = vpop.xlane.xlu0 %35 }
  0x93   :  { %v39_v9 = vmul.f32 0.03125, %v36_v8  ;;  %v42_v10 = vmul.f32 %v40_v7, %v40_v7 }
  0x95   :  { %v41_v11 = vsub.f32 %v194_v2, %v39_v9  ;;  %v44_v12 = vsel %vm30_vm0, %v42_v10, 0.0 }
  0x96   :  { %45 = vadd.xlane.f32.xlu1 %v44_v12 }
  0x97   :  { %v43_v13 = vmul.f32 %v41_v11, %v41_v11 }
  0x99   :  { %v47_v14 = vsel %vm30_vm0, %v43_v13, 0.0 }
  0x9a   :  { %48 = vadd.xlane.f32.xlu1 %v47_v14 }
 0x11f   :  { %v46_v18 = vpop.xlane.xlu1 %45 }
 0x120   :  { %v50_v19 = vmul.f32 0.03125, %v46_v18 }
 0x122   :  { %v52_v20 = vadd.f32 1e-05, %v50_v19 }
 0x123   :  { %v49_v21 = vpop.xlane.xlu1 %48 }
 0x124   :  { %214 = vrsqrt.f32 %v52_v20  ;;  %v51_v22 = vmul.f32 0.03125, %v49_v21 }
 0x126   :  { %v53_v23 = vadd.f32 1e-05, %v51_v22 }
 0x128   :  { %216 = vrsqrt.f32 %v53_v23 }
 0x131   :  { %v215_v24 = vpop.eup %214 }
 0x132   :  { %v56_v26 = vmul.f32 %v215_v24, %v40_v7 }
 0x134   :  { %v65_v28 = vmul.f32 %v180_v25, %v56_v26 }
 0x135   :  { %v217_v29 = vpop.eup %216 }
 0x136   :  { %v74_v30 = vadd.f32 %v181_v27, %v65_v28  ;;  %v57_v31 = vmul.f32 %v217_v29, %v41_v11 }
 0x138   :  { %v189_v32 = vpack.c.bf16 %v74_v30, %v74_v30  ;;  %v66_v33 = vmul.f32 %v180_v25, %v57_v31 }
 0x13a   :  { %85 = vst.msk [vmem:[#allocation2] sm:$0xf] %vm84_vm2, %v189_v32  ;;  %v75_v34 = vadd.f32 %v181_v27, %v66_v33 }
 0x13c   :  { %v190_v35 = vpack.c.bf16 %v75_v34, %v75_v34 }
 0x13e   :  { %86 = vst.msk [vmem:[#allocation2 + $0x4] sm:$0xf] %vm84_vm2, %v190_v35 }
 0x145   :  { %v213_v36 = vld [vmem:[#allocation2] sm:$0xff]  }
 0x146   :  { %203 = vmatmul.mubr.msk.bf16.vlgmr.msra.gmra.mxu0 %vm30_vm0, %v213_v36 }
 0x206   :  { %v155_v38 = vpop.f32.mrf.mxu0 }
 0x207   :  { %v156_v39 = vadd.f32 %v184_v37, %v155_v38 }
 0x208   :  { %v204_v40 = vpop.f32.mrf.mxu0 }
 0x209   :  { %162 = vst.msk [vmem:[#allocation3] sm:$0xff] %vm30_vm0, %v156_v39 }
 0x20a   :  { %v158_v41 = vpop.f32.mrf.mxu0 }
 0x20b   :  { %v159_v42 = vadd.f32 %v184_v37, %v158_v41 }
 0x20c   :  { %v205_v43 = vpop.f32.mrf.mxu0 }
 0x20d   :  { %163 = vst.msk [vmem:[#allocation3 + $0x8] sm:$0xff] %vm30_vm0, %v159_v42 }
 0x20e   :  { %229 = shalt.err (!%p226_p4)
}
 0x20f   :  { %s243_s2 = smov 128   ;;  %s244_s29 = smov 8  }
 0x210   :  { %175 = dma.vmem_to_hbm [thread:$0]  %s170_s27, 256, %s308_s5, [#allocation4], %s243_s2, %s243_s2, %s244_s29  }
 0x211   :  { %238 = dma.done.wait [#allocation4], 256  }
 0x212   :  { %239 = vsyncadd [#allocation4], 4294967040 }
 0x213   :  { %179 = vsyncpa [#allocation4], 1 }

</bundles_post_ra>
